<compile_context>
chip_gen: v6e
topology: v6e:2x2x1
jax: 0.10.0
libtpu: 0.0.40
codegen_flags: <defaults>
</compile_context>

<pallas_src>
import jax
import jax.numpy as jnp
from jax.experimental import pallas as pl
from jax.experimental.pallas import tpu as pltpu


def _bilstm_kernel(lengths_ref, x_ref, wx_ref, bx_ref, uf_ref, ub_ref,
                   out_f_ref, out_b_ref, hn_ref, cn_ref):
    H = uf_ref.shape[0]
    G4 = 4 * H
    bB, T, _ = out_f_ref.shape

    lengths = lengths_ref[...]                       # (bB, 1) int32

    # ---- hoisted input projection: one MXU-friendly GEMM, biases folded in ----
    # x rows are time-major: row t*bB + j  <->  (timestep t, local batch j)
    pre = jnp.dot(x_ref[...], wx_ref[...],
                  preferred_element_type=jnp.float32) + bx_ref[...]   # (T*bB, 8H) f32

    uf = uf_ref[...]                                 # (H, 4H) bf16
    ub = ub_ref[...]                                 # (H, 4H) bf16

    def gates_to_hc(g, c_prev):
        # PyTorch gate order i, f, g, o — elementwise math kept in f32.
        i = jax.nn.sigmoid(g[:, 0 * H:1 * H])
        f = jax.nn.sigmoid(g[:, 1 * H:2 * H])
        gg = jnp.tanh(g[:, 2 * H:3 * H])
        o = jax.nn.sigmoid(g[:, 3 * H:4 * H])
        c_new = f * c_prev + i * gg
        h_new = o * jnp.tanh(c_new)
        return h_new, c_new

    zeros = jnp.zeros((bB, H), jnp.float32)
    h_f, c_f = zeros, zeros
    h_b, c_b = zeros, zeros

    # Fused forward/backward recurrence; T is small & static here so the loop
    # is unrolled.  TODO(synk): switch to lax.fori_loop (carrying h/c, writing
    # through refs) once T grows beyond a handful of steps.
    for s in range(T):
        tf = s
        tb = T - 1 - s

        rec_f = jnp.dot(h_f.astype(jnp.bfloat16), uf,
                        preferred_element_type=jnp.float32)
        rec_b = jnp.dot(h_b.astype(jnp.bfloat16), ub,
                        preferred_element_type=jnp.float32)

        g_f = pre[tf * bB:(tf + 1) * bB, 0:G4] + rec_f
        g_b = pre[tb * bB:(tb + 1) * bB, G4:2 * G4] + rec_b

        hf_new, cf_new = gates_to_hc(g_f, c_f)
        hb_new, cb_new = gates_to_hc(g_b, c_b)

        valid_f = tf < lengths                       # (bB, 1) bool mask (pack/pad)
        valid_b = tb < lengths

        h_f = jnp.where(valid_f, hf_new, h_f)
        c_f = jnp.where(valid_f, cf_new, c_f)
        h_b = jnp.where(valid_b, hb_new, h_b)
        c_b = jnp.where(valid_b, cb_new, c_b)

        # dense-last-dim stores (full H lanes of one time row), no striding
        out_f_ref[:, tf, :] = jnp.where(valid_f, hf_new, 0.0)
        out_b_ref[:, tb, :] = jnp.where(valid_b, hb_new, 0.0)

    hn_ref[:, 0:H] = h_f
    hn_ref[:, H:2 * H] = h_b
    cn_ref[:, 0:H] = c_f
    cn_ref[:, H:2 * H] = c_b


def encoder_forward(x, lengths, params):
    """x: (B, T) int32 tokens, lengths: (B,) int32 (sorted descending)."""
    B, T = x.shape
    E = params["embedding"].shape[1]
    H = params["w_hh_f"].shape[0]

    # batch block: whole batch when small, 8-sublane tiles otherwise
    bB = 8 if (B % 8 == 0) else B
    nb = B // bB

    # Glue: embedding lookup; Dropout(0.3) is identity in eval mode.
    emb = jnp.take(params["embedding"], x, axis=0)        # (B, T, E) f32

    # Time-major, batch-blocked 2D layout for the hoisted input GEMM:
    # global row (i*T*bB + t*bB + j)  <->  (batch i*bB + j, time t)
    x_rows = (emb.transpose(1, 0, 2)                      # (T, B, E)
                 .reshape(T, nb, bB, E)
                 .transpose(1, 0, 2, 3)                   # (nb, T, bB, E)
                 .reshape(nb * T * bB, E)
                 .astype(jnp.bfloat16))

    wx = jnp.concatenate([params["w_ih_f"], params["w_ih_b"]],
                         axis=1).astype(jnp.bfloat16)     # (E, 8H)
    bx = jnp.concatenate([params["b_f"], params["b_b"]], axis=1)  # (1, 8H) f32
    uf = params["w_hh_f"].astype(jnp.bfloat16)            # (H, 4H)
    ub = params["w_hh_b"].astype(jnp.bfloat16)            # (H, 4H)

    lengths2d = lengths.astype(jnp.int32).reshape(B, 1)

    out_shapes = (
        jax.ShapeDtypeStruct((B, T, H), jnp.float32),     # forward direction
        jax.ShapeDtypeStruct((B, T, H), jnp.float32),     # backward direction
        jax.ShapeDtypeStruct((B, 2 * H), jnp.float32),    # h_n (permuted/reshaped)
        jax.ShapeDtypeStruct((B, 2 * H), jnp.float32),    # c_n
    )

    in_specs = [
        pl.BlockSpec((bB, 1), lambda i: (i, 0)),          # lengths
        pl.BlockSpec((T * bB, E), lambda i: (i, 0)),      # time-major embeddings
        pl.BlockSpec((E, 8 * H), lambda i: (0, 0)),       # [W_ih_f | W_ih_b]
        pl.BlockSpec((1, 8 * H), lambda i: (0, 0)),       # folded biases
        pl.BlockSpec((H, 4 * H), lambda i: (0, 0)),       # W_hh_f
        pl.BlockSpec((H, 4 * H), lambda i: (0, 0)),       # W_hh_b
    ]
    out_specs = (
        pl.BlockSpec((bB, T, H), lambda i: (i, 0, 0)),
        pl.BlockSpec((bB, T, H), lambda i: (i, 0, 0)),
        pl.BlockSpec((bB, 2 * H), lambda i: (i, 0)),
        pl.BlockSpec((bB, 2 * H), lambda i: (i, 0)),
    )

    out_f, out_b, h_n, c_n = pl.pallas_call(
        _bilstm_kernel,
        out_shape=out_shapes,
        grid=(nb,),
        in_specs=in_specs,
        out_specs=out_specs,
        compiler_params=pltpu.CompilerParams(
            dimension_semantics=("parallel",)),
    )(lengths2d, x_rows, wx, bx, uf, ub)

    output = jnp.concatenate([out_f, out_b], axis=-1)     # (B, T, 2H)
    return output, (h_n, c_n)


def init_params(key, vocab_size, hidden_size, emb_size):
    ks = jax.random.split(key, 9)
    s = 1.0 / jnp.sqrt(hidden_size)
    H4 = 4 * hidden_size

    def unif(k, shape):
        return jax.random.uniform(k, shape, jnp.float32, -s, s)

    return {
        "embedding": jax.random.normal(ks[0], (vocab_size, emb_size), jnp.float32),
        # stored transposed relative to PyTorch: (E, 4H) / (H, 4H)
        "w_ih_f": unif(ks[1], (emb_size, H4)),
        "w_hh_f": unif(ks[2], (hidden_size, H4)),
        # combined bias b_ih + b_hh, kept 2D for clean VMEM layout
        "b_f": unif(ks[3], (1, H4)) + unif(ks[4], (1, H4)),
        "w_ih_b": unif(ks[5], (emb_size, H4)),
        "w_hh_b": unif(ks[6], (hidden_size, H4)),
        "b_b": unif(ks[7], (1, H4)) + unif(ks[8], (1, H4)),
    }


if __name__ == "__main__":
    VOCAB, HIDDEN, EMB = 50, 32, 32
    B, T = 2, 8

    key = jax.random.PRNGKey(0)
    kp, kx = jax.random.split(key)
    params = init_params(kp, VOCAB, HIDDEN, EMB)

    x = jax.random.randint(kx, (B, T), 0, VOCAB, dtype=jnp.int32)
    lengths = jnp.array([8, 5], dtype=jnp.int32)   # sorted descending (pack_padded_sequence)

    output, (h_n, c_n) = encoder_forward(x, lengths, params)
    jax.block_until_ready((output, h_n, c_n))

    assert output.shape == (B, T, 2 * HIDDEN)
    assert h_n.shape == (B, 2 * HIDDEN) and c_n.shape == (B, 2 * HIDDEN)
    assert bool(jnp.all(jnp.isfinite(output)))
    # padded timesteps of the shorter sequence must be zero (pad_packed_sequence semantics)
    assert bool(jnp.all(output[1, 5:, :] == 0.0))

    print("KERNEL_OK")
</pallas_src>

<mosaic_0001>
module attributes {stable_mosaic.version = 11 : i64} {
  func.func @_bilstm_kernel(%arg0: i32, %arg1: memref<2x1xi32, #tpu.memory_space<vmem>>, %arg2: memref<16x32xbf16, #tpu.memory_space<vmem>>, %arg3: memref<32x256xbf16, #tpu.memory_space<vmem>>, %arg4: memref<1x256xf32, #tpu.memory_space<vmem>>, %arg5: memref<32x128xbf16, #tpu.memory_space<vmem>>, %arg6: memref<32x128xbf16, #tpu.memory_space<vmem>>, %arg7: memref<2x8x32xf32, #tpu.memory_space<vmem>>, %arg8: memref<2x8x32xf32, #tpu.memory_space<vmem>>, %arg9: memref<2x64xf32, #tpu.memory_space<vmem>>, %arg10: memref<2x64xf32, #tpu.memory_space<vmem>>) attributes {dimension_semantics = [#tpu.dimension_semantics<parallel>], iteration_bounds = array<i64: 1>, scalar_prefetch = 0 : i64, scratch_operands = 0 : i64, tpu.core_type = #tpu.core_type<tc>, window_params = [{transform_indices = @transform_0, window_bounds = array<i64: 2, 1>}, {transform_indices = @transform_1, window_bounds = array<i64: 16, 32>}, {pipeline_mode = #tpu.pipeline_mode<synchronous>, transform_indices = @transform_2, window_bounds = array<i64: 32, 256>}, {pipeline_mode = #tpu.pipeline_mode<synchronous>, transform_indices = @transform_3, window_bounds = array<i64: 1, 256>}, {pipeline_mode = #tpu.pipeline_mode<synchronous>, transform_indices = @transform_4, window_bounds = array<i64: 32, 128>}, {pipeline_mode = #tpu.pipeline_mode<synchronous>, transform_indices = @transform_5, window_bounds = array<i64: 32, 128>}, {transform_indices = @transform_6, window_bounds = array<i64: 2, 8, 32>}, {transform_indices = @transform_7, window_bounds = array<i64: 2, 8, 32>}, {transform_indices = @transform_8, window_bounds = array<i64: 2, 64>}, {transform_indices = @transform_9, window_bounds = array<i64: 2, 64>}]} {
    %c0 = arith.constant 0 : index
    %c0_0 = arith.constant 0 : index
    %0 = vector.load %arg1[%c0, %c0_0] : memref<2x1xi32, #tpu.memory_space<vmem>>, vector<2x1xi32>
    %c0_1 = arith.constant 0 : index
    %c0_2 = arith.constant 0 : index
    %1 = vector.load %arg2[%c0_1, %c0_2] : memref<16x32xbf16, #tpu.memory_space<vmem>>, vector<16x32xbf16>
    %c0_3 = arith.constant 0 : index
    %c0_4 = arith.constant 0 : index
    %2 = vector.load %arg3[%c0_3, %c0_4] : memref<32x256xbf16, #tpu.memory_space<vmem>>, vector<32x256xbf16>
    %cst = arith.constant dense<0.000000e+00> : vector<16x256xf32>
    %3 = tpu.matmul %1, %2, %cst {dimension_numbers = #tpu.dot_dimension_numbers<[1], [0], [0], [1], [0, 0, 1, 1], [], []>} : vector<16x32xbf16>, vector<32x256xbf16>, vector<16x256xf32> -> vector<16x256xf32>
    %c0_5 = arith.constant 0 : index
    %c0_6 = arith.constant 0 : index
    %4 = vector.load %arg4[%c0_5, %c0_6] : memref<1x256xf32, #tpu.memory_space<vmem>>, vector<1x256xf32>
    %5 = vector.broadcast %4 : vector<1x256xf32> to vector<16x256xf32>
    %6 = arith.addf %3, %5 : vector<16x256xf32>
    %c0_7 = arith.constant 0 : index
    %c0_8 = arith.constant 0 : index
    %7 = vector.load %arg5[%c0_7, %c0_8] : memref<32x128xbf16, #tpu.memory_space<vmem>>, vector<32x128xbf16>
    %c0_9 = arith.constant 0 : index
    %c0_10 = arith.constant 0 : index
    %8 = vector.load %arg6[%c0_9, %c0_10] : memref<32x128xbf16, #tpu.memory_space<vmem>>, vector<32x128xbf16>
    %cst_11 = arith.constant 0.000000e+00 : f32
    %9 = vector.broadcast %cst_11 : f32 to vector<2x32xf32>
    %10 = arith.truncf %9 : vector<2x32xf32> to vector<2x32xbf16>
    %cst_12 = arith.constant dense<0.000000e+00> : vector<2x128xf32>
    %11 = tpu.matmul %10, %7, %cst_12 {dimension_numbers = #tpu.dot_dimension_numbers<[1], [0], [0], [1], [0, 0, 1, 1], [], []>} : vector<2x32xbf16>, vector<32x128xbf16>, vector<2x128xf32> -> vector<2x128xf32>
    %12 = arith.truncf %9 : vector<2x32xf32> to vector<2x32xbf16>
    %cst_13 = arith.constant dense<0.000000e+00> : vector<2x128xf32>
    %13 = tpu.matmul %12, %8, %cst_13 {dimension_numbers = #tpu.dot_dimension_numbers<[1], [0], [0], [1], [0, 0, 1, 1], [], []>} : vector<2x32xbf16>, vector<32x128xbf16>, vector<2x128xf32> -> vector<2x128xf32>
    %14 = vector.extract_strided_slice %6 {offsets = [0, 0], sizes = [2, 128], strides = [1, 1]} : vector<16x256xf32> to vector<2x128xf32>
    %15 = arith.addf %14, %11 : vector<2x128xf32>
    %16 = vector.extract_strided_slice %6 {offsets = [14, 128], sizes = [2, 128], strides = [1, 1]} : vector<16x256xf32> to vector<2x128xf32>
    %17 = arith.addf %16, %13 : vector<2x128xf32>
    %18 = vector.extract_strided_slice %15 {offsets = [0, 0], sizes = [2, 32], strides = [1, 1]} : vector<2x128xf32> to vector<2x32xf32>
    %19 = arith.negf %18 : vector<2x32xf32>
    %20 = math.exp %19 : vector<2x32xf32>
    %cst_14 = arith.constant 1.000000e+00 : f32
    %21 = vector.broadcast %cst_14 : f32 to vector<2x32xf32>
    %22 = arith.addf %21, %20 : vector<2x32xf32>
    %23 = arith.divf %21, %22 : vector<2x32xf32>
    %24 = vector.extract_strided_slice %15 {offsets = [0, 32], sizes = [2, 32], strides = [1, 1]} : vector<2x128xf32> to vector<2x32xf32>
    %25 = arith.negf %24 : vector<2x32xf32>
    %26 = math.exp %25 : vector<2x32xf32>
    %cst_15 = arith.constant 1.000000e+00 : f32
    %27 = vector.broadcast %cst_15 : f32 to vector<2x32xf32>
    %28 = arith.addf %27, %26 : vector<2x32xf32>
    %29 = arith.divf %27, %28 : vector<2x32xf32>
    %30 = vector.extract_strided_slice %15 {offsets = [0, 64], sizes = [2, 32], strides = [1, 1]} : vector<2x128xf32> to vector<2x32xf32>
    %31 = math.tanh %30 : vector<2x32xf32>
    %32 = vector.extract_strided_slice %15 {offsets = [0, 96], sizes = [2, 32], strides = [1, 1]} : vector<2x128xf32> to vector<2x32xf32>
    %33 = arith.negf %32 : vector<2x32xf32>
    %34 = math.exp %33 : vector<2x32xf32>
    %cst_16 = arith.constant 1.000000e+00 : f32
    %35 = vector.broadcast %cst_16 : f32 to vector<2x32xf32>
    %36 = arith.addf %35, %34 : vector<2x32xf32>
    %37 = arith.divf %35, %36 : vector<2x32xf32>
    %38 = arith.mulf %29, %9 : vector<2x32xf32>
    %39 = arith.mulf %23, %31 : vector<2x32xf32>
    %40 = arith.addf %38, %39 : vector<2x32xf32>
    %41 = math.tanh %40 : vector<2x32xf32>
    %42 = arith.mulf %37, %41 : vector<2x32xf32>
    %43 = vector.extract_strided_slice %17 {offsets = [0, 0], sizes = [2, 32], strides = [1, 1]} : vector<2x128xf32> to vector<2x32xf32>
    %44 = arith.negf %43 : vector<2x32xf32>
    %45 = math.exp %44 : vector<2x32xf32>
    %cst_17 = arith.constant 1.000000e+00 : f32
    %46 = vector.broadcast %cst_17 : f32 to vector<2x32xf32>
    %47 = arith.addf %46, %45 : vector<2x32xf32>
    %48 = arith.divf %46, %47 : vector<2x32xf32>
    %49 = vector.extract_strided_slice %17 {offsets = [0, 32], sizes = [2, 32], strides = [1, 1]} : vector<2x128xf32> to vector<2x32xf32>
    %50 = arith.negf %49 : vector<2x32xf32>
    %51 = math.exp %50 : vector<2x32xf32>
    %cst_18 = arith.constant 1.000000e+00 : f32
    %52 = vector.broadcast %cst_18 : f32 to vector<2x32xf32>
    %53 = arith.addf %52, %51 : vector<2x32xf32>
    %54 = arith.divf %52, %53 : vector<2x32xf32>
    %55 = vector.extract_strided_slice %17 {offsets = [0, 64], sizes = [2, 32], strides = [1, 1]} : vector<2x128xf32> to vector<2x32xf32>
    %56 = math.tanh %55 : vector<2x32xf32>
    %57 = vector.extract_strided_slice %17 {offsets = [0, 96], sizes = [2, 32], strides = [1, 1]} : vector<2x128xf32> to vector<2x32xf32>
    %58 = arith.negf %57 : vector<2x32xf32>
    %59 = math.exp %58 : vector<2x32xf32>
    %cst_19 = arith.constant 1.000000e+00 : f32
    %60 = vector.broadcast %cst_19 : f32 to vector<2x32xf32>
    %61 = arith.addf %60, %59 : vector<2x32xf32>
    %62 = arith.divf %60, %61 : vector<2x32xf32>
    %63 = arith.mulf %54, %9 : vector<2x32xf32>
    %64 = arith.mulf %48, %56 : vector<2x32xf32>
    %65 = arith.addf %63, %64 : vector<2x32xf32>
    %66 = math.tanh %65 : vector<2x32xf32>
    %67 = arith.mulf %62, %66 : vector<2x32xf32>
    %c0_i32 = arith.constant 0 : i32
    %68 = vector.broadcast %c0_i32 : i32 to vector<2x1xi32>
    %69 = arith.cmpi sgt, %0, %68 : vector<2x1xi32>
    %c7_i32 = arith.constant 7 : i32
    %70 = vector.broadcast %c7_i32 : i32 to vector<2x1xi32>
    %71 = arith.cmpi sgt, %0, %70 : vector<2x1xi32>
    %72 = vector.shape_cast %69 : vector<2x1xi1> to vector<2x1xi1>
    %73 = vector.broadcast %72 : vector<2x1xi1> to vector<2x32xi1>
    %74 = arith.select %73, %42, %9 : vector<2x32xi1>, vector<2x32xf32>
    %75 = vector.shape_cast %69 : vector<2x1xi1> to vector<2x1xi1>
    %76 = vector.broadcast %75 : vector<2x1xi1> to vector<2x32xi1>
    %77 = arith.select %76, %40, %9 : vector<2x32xi1>, vector<2x32xf32>
    %78 = vector.shape_cast %71 : vector<2x1xi1> to vector<2x1xi1>
    %79 = vector.broadcast %78 : vector<2x1xi1> to vector<2x32xi1>
    %80 = arith.select %79, %67, %9 : vector<2x32xi1>, vector<2x32xf32>
    %81 = vector.shape_cast %71 : vector<2x1xi1> to vector<2x1xi1>
    %82 = vector.broadcast %81 : vector<2x1xi1> to vector<2x32xi1>
    %83 = arith.select %82, %65, %9 : vector<2x32xi1>, vector<2x32xf32>
    %cst_20 = arith.constant 0.000000e+00 : f32
    %84 = vector.shape_cast %69 : vector<2x1xi1> to vector<2x1xi1>
    %85 = vector.broadcast %84 : vector<2x1xi1> to vector<2x32xi1>
    %86 = vector.broadcast %cst_20 : f32 to vector<2x32xf32>
    %87 = arith.select %85, %42, %86 : vector<2x32xi1>, vector<2x32xf32>
    %c0_21 = arith.constant 0 : index
    %c0_22 = arith.constant 0 : index
    %c0_23 = arith.constant 0 : index
    %88 = vector.load %arg7[%c0_21, %c0_22, %c0_23] : memref<2x8x32xf32, #tpu.memory_space<vmem>>, vector<2x1x32xf32>
    %89 = vector.shape_cast %88 : vector<2x1x32xf32> to vector<2x32xf32>
    %90 = vector.shape_cast %87 : vector<2x32xf32> to vector<2x1x32xf32>
    tpu.vector_store %arg7[%c0_21, %c0_22, %c0_23], %90 {strides = array<i32>} : memref<2x8x32xf32, #tpu.memory_space<vmem>>, vector<2x1x32xf32>,
    %cst_24 = arith.constant 0.000000e+00 : f32
    %91 = vector.shape_cast %71 : vector<2x1xi1> to vector<2x1xi1>
    %92 = vector.broadcast %91 : vector<2x1xi1> to vector<2x32xi1>
    %93 = vector.broadcast %cst_24 : f32 to vector<2x32xf32>
    %94 = arith.select %92, %67, %93 : vector<2x32xi1>, vector<2x32xf32>
    %c0_25 = arith.constant 0 : index
    %c7 = arith.constant 7 : index
    %c0_26 = arith.constant 0 : index
    %95 = vector.load %arg8[%c0_25, %c7, %c0_26] : memref<2x8x32xf32, #tpu.memory_space<vmem>>, vector<2x1x32xf32>
    %96 = vector.shape_cast %95 : vector<2x1x32xf32> to vector<2x32xf32>
    %97 = vector.shape_cast %94 : vector<2x32xf32> to vector<2x1x32xf32>
    tpu.vector_store %arg8[%c0_25, %c7, %c0_26], %97 {strides = array<i32>} : memref<2x8x32xf32, #tpu.memory_space<vmem>>, vector<2x1x32xf32>,
    %98 = arith.truncf %74 : vector<2x32xf32> to vector<2x32xbf16>
    %cst_27 = arith.constant dense<0.000000e+00> : vector<2x128xf32>
    %99 = tpu.matmul %98, %7, %cst_27 {dimension_numbers = #tpu.dot_dimension_numbers<[1], [0], [0], [1], [0, 0, 1, 1], [], []>} : vector<2x32xbf16>, vector<32x128xbf16>, vector<2x128xf32> -> vector<2x128xf32>
    %100 = arith.truncf %80 : vector<2x32xf32> to vector<2x32xbf16>
    %cst_28 = arith.constant dense<0.000000e+00> : vector<2x128xf32>
    %101 = tpu.matmul %100, %8, %cst_28 {dimension_numbers = #tpu.dot_dimension_numbers<[1], [0], [0], [1], [0, 0, 1, 1], [], []>} : vector<2x32xbf16>, vector<32x128xbf16>, vector<2x128xf32> -> vector<2x128xf32>
    %102 = vector.extract_strided_slice %6 {offsets = [2, 0], sizes = [2, 128], strides = [1, 1]} : vector<16x256xf32> to vector<2x128xf32>
    %103 = arith.addf %102, %99 : vector<2x128xf32>
    %104 = vector.extract_strided_slice %6 {offsets = [12, 128], sizes = [2, 128], strides = [1, 1]} : vector<16x256xf32> to vector<2x128xf32>
    %105 = arith.addf %104, %101 : vector<2x128xf32>
    %106 = vector.extract_strided_slice %103 {offsets = [0, 0], sizes = [2, 32], strides = [1, 1]} : vector<2x128xf32> to vector<2x32xf32>
    %107 = arith.negf %106 : vector<2x32xf32>
    %108 = math.exp %107 : vector<2x32xf32>
    %cst_29 = arith.constant 1.000000e+00 : f32
    %109 = vector.broadcast %cst_29 : f32 to vector<2x32xf32>
    %110 = arith.addf %109, %108 : vector<2x32xf32>
    %111 = arith.divf %109, %110 : vector<2x32xf32>
    %112 = vector.extract_strided_slice %103 {offsets = [0, 32], sizes = [2, 32], strides = [1, 1]} : vector<2x128xf32> to vector<2x32xf32>
    %113 = arith.negf %112 : vector<2x32xf32>
    %114 = math.exp %113 : vector<2x32xf32>
    %cst_30 = arith.constant 1.000000e+00 : f32
    %115 = vector.broadcast %cst_30 : f32 to vector<2x32xf32>
    %116 = arith.addf %115, %114 : vector<2x32xf32>
    %117 = arith.divf %115, %116 : vector<2x32xf32>
    %118 = vector.extract_strided_slice %103 {offsets = [0, 64], sizes = [2, 32], strides = [1, 1]} : vector<2x128xf32> to vector<2x32xf32>
    %119 = math.tanh %118 : vector<2x32xf32>
    %120 = vector.extract_strided_slice %103 {offsets = [0, 96], sizes = [2, 32], strides = [1, 1]} : vector<2x128xf32> to vector<2x32xf32>
    %121 = arith.negf %120 : vector<2x32xf32>
    %122 = math.exp %121 : vector<2x32xf32>
    %cst_31 = arith.constant 1.000000e+00 : f32
    %123 = vector.broadcast %cst_31 : f32 to vector<2x32xf32>
    %124 = arith.addf %123, %122 : vector<2x32xf32>
    %125 = arith.divf %123, %124 : vector<2x32xf32>
    %126 = arith.mulf %117, %77 : vector<2x32xf32>
    %127 = arith.mulf %111, %119 : vector<2x32xf32>
    %128 = arith.addf %126, %127 : vector<2x32xf32>
    %129 = math.tanh %128 : vector<2x32xf32>
    %130 = arith.mulf %125, %129 : vector<2x32xf32>
    %131 = vector.extract_strided_slice %105 {offsets = [0, 0], sizes = [2, 32], strides = [1, 1]} : vector<2x128xf32> to vector<2x32xf32>
    %132 = arith.negf %131 : vector<2x32xf32>
    %133 = math.exp %132 : vector<2x32xf32>
    %cst_32 = arith.constant 1.000000e+00 : f32
    %134 = vector.broadcast %cst_32 : f32 to vector<2x32xf32>
    %135 = arith.addf %134, %133 : vector<2x32xf32>
    %136 = arith.divf %134, %135 : vector<2x32xf32>
    %137 = vector.extract_strided_slice %105 {offsets = [0, 32], sizes = [2, 32], strides = [1, 1]} : vector<2x128xf32> to vector<2x32xf32>
    %138 = arith.negf %137 : vector<2x32xf32>
    %139 = math.exp %138 : vector<2x32xf32>
    %cst_33 = arith.constant 1.000000e+00 : f32
    %140 = vector.broadcast %cst_33 : f32 to vector<2x32xf32>
    %141 = arith.addf %140, %139 : vector<2x32xf32>
    %142 = arith.divf %140, %141 : vector<2x32xf32>
    %143 = vector.extract_strided_slice %105 {offsets = [0, 64], sizes = [2, 32], strides = [1, 1]} : vector<2x128xf32> to vector<2x32xf32>
    %144 = math.tanh %143 : vector<2x32xf32>
    %145 = vector.extract_strided_slice %105 {offsets = [0, 96], sizes = [2, 32], strides = [1, 1]} : vector<2x128xf32> to vector<2x32xf32>
    %146 = arith.negf %145 : vector<2x32xf32>
    %147 = math.exp %146 : vector<2x32xf32>
    %cst_34 = arith.constant 1.000000e+00 : f32
    %148 = vector.broadcast %cst_34 : f32 to vector<2x32xf32>
    %149 = arith.addf %148, %147 : vector<2x32xf32>
    %150 = arith.divf %148, %149 : vector<2x32xf32>
    %151 = arith.mulf %142, %83 : vector<2x32xf32>
    %152 = arith.mulf %136, %144 : vector<2x32xf32>
    %153 = arith.addf %151, %152 : vector<2x32xf32>
    %154 = math.tanh %153 : vector<2x32xf32>
    %155 = arith.mulf %150, %154 : vector<2x32xf32>
    %c1_i32 = arith.constant 1 : i32
    %156 = vector.broadcast %c1_i32 : i32 to vector<2x1xi32>
    %157 = arith.cmpi sgt, %0, %156 : vector<2x1xi32>
    %c6_i32 = arith.constant 6 : i32
    %158 = vector.broadcast %c6_i32 : i32 to vector<2x1xi32>
    %159 = arith.cmpi sgt, %0, %158 : vector<2x1xi32>
    %160 = vector.shape_cast %157 : vector<2x1xi1> to vector<2x1xi1>
    %161 = vector.broadcast %160 : vector<2x1xi1> to vector<2x32xi1>
    %162 = arith.select %161, %130, %74 : vector<2x32xi1>, vector<2x32xf32>
    %163 = vector.shape_cast %157 : vector<2x1xi1> to vector<2x1xi1>
    %164 = vector.broadcast %163 : vector<2x1xi1> to vector<2x32xi1>
    %165 = arith.select %164, %128, %77 : vector<2x32xi1>, vector<2x32xf32>
    %166 = vector.shape_cast %159 : vector<2x1xi1> to vector<2x1xi1>
    %167 = vector.broadcast %166 : vector<2x1xi1> to vector<2x32xi1>
    %168 = arith.select %167, %155, %80 : vector<2x32xi1>, vector<2x32xf32>
    %169 = vector.shape_cast %159 : vector<2x1xi1> to vector<2x1xi1>
    %170 = vector.broadcast %169 : vector<2x1xi1> to vector<2x32xi1>
    %171 = arith.select %170, %153, %83 : vector<2x32xi1>, vector<2x32xf32>
    %cst_35 = arith.constant 0.000000e+00 : f32
    %172 = vector.shape_cast %157 : vector<2x1xi1> to vector<2x1xi1>
    %173 = vector.broadcast %172 : vector<2x1xi1> to vector<2x32xi1>
    %174 = vector.broadcast %cst_35 : f32 to vector<2x32xf32>
    %175 = arith.select %173, %130, %174 : vector<2x32xi1>, vector<2x32xf32>
    %c0_36 = arith.constant 0 : index
    %c1 = arith.constant 1 : index
    %c0_37 = arith.constant 0 : index
    %176 = vector.load %arg7[%c0_36, %c1, %c0_37] : memref<2x8x32xf32, #tpu.memory_space<vmem>>, vector<2x1x32xf32>
    %177 = vector.shape_cast %176 : vector<2x1x32xf32> to vector<2x32xf32>
    %178 = vector.shape_cast %175 : vector<2x32xf32> to vector<2x1x32xf32>
    tpu.vector_store %arg7[%c0_36, %c1, %c0_37], %178 {strides = array<i32>} : memref<2x8x32xf32, #tpu.memory_space<vmem>>, vector<2x1x32xf32>,
    %cst_38 = arith.constant 0.000000e+00 : f32
    %179 = vector.shape_cast %159 : vector<2x1xi1> to vector<2x1xi1>
    %180 = vector.broadcast %179 : vector<2x1xi1> to vector<2x32xi1>
    %181 = vector.broadcast %cst_38 : f32 to vector<2x32xf32>
    %182 = arith.select %180, %155, %181 : vector<2x32xi1>, vector<2x32xf32>
    %c0_39 = arith.constant 0 : index
    %c6 = arith.constant 6 : index
    %c0_40 = arith.constant 0 : index
    %183 = vector.load %arg8[%c0_39, %c6, %c0_40] : memref<2x8x32xf32, #tpu.memory_space<vmem>>, vector<2x1x32xf32>
    %184 = vector.shape_cast %183 : vector<2x1x32xf32> to vector<2x32xf32>
    %185 = vector.shape_cast %182 : vector<2x32xf32> to vector<2x1x32xf32>
    tpu.vector_store %arg8[%c0_39, %c6, %c0_40], %185 {strides = array<i32>} : memref<2x8x32xf32, #tpu.memory_space<vmem>>, vector<2x1x32xf32>,
    %186 = arith.truncf %162 : vector<2x32xf32> to vector<2x32xbf16>
    %cst_41 = arith.constant dense<0.000000e+00> : vector<2x128xf32>
    %187 = tpu.matmul %186, %7, %cst_41 {dimension_numbers = #tpu.dot_dimension_numbers<[1], [0], [0], [1], [0, 0, 1, 1], [], []>} : vector<2x32xbf16>, vector<32x128xbf16>, vector<2x128xf32> -> vector<2x128xf32>
    %188 = arith.truncf %168 : vector<2x32xf32> to vector<2x32xbf16>
    %cst_42 = arith.constant dense<0.000000e+00> : vector<2x128xf32>
    %189 = tpu.matmul %188, %8, %cst_42 {dimension_numbers = #tpu.dot_dimension_numbers<[1], [0], [0], [1], [0, 0, 1, 1], [], []>} : vector<2x32xbf16>, vector<32x128xbf16>, vector<2x128xf32> -> vector<2x128xf32>
    %190 = vector.extract_strided_slice %6 {offsets = [4, 0], sizes = [2, 128], strides = [1, 1]} : vector<16x256xf32> to vector<2x128xf32>
    %191 = arith.addf %190, %187 : vector<2x128xf32>
    %192 = vector.extract_strided_slice %6 {offsets = [10, 128], sizes = [2, 128], strides = [1, 1]} : vector<16x256xf32> to vector<2x128xf32>
    %193 = arith.addf %192, %189 : vector<2x128xf32>
    %194 = vector.extract_strided_slice %191 {offsets = [0, 0], sizes = [2, 32], strides = [1, 1]} : vector<2x128xf32> to vector<2x32xf32>
    %195 = arith.negf %194 : vector<2x32xf32>
    %196 = math.exp %195 : vector<2x32xf32>
    %cst_43 = arith.constant 1.000000e+00 : f32
    %197 = vector.broadcast %cst_43 : f32 to vector<2x32xf32>
    %198 = arith.addf %197, %196 : vector<2x32xf32>
    %199 = arith.divf %197, %198 : vector<2x32xf32>
    %200 = vector.extract_strided_slice %191 {offsets = [0, 32], sizes = [2, 32], strides = [1, 1]} : vector<2x128xf32> to vector<2x32xf32>
    %201 = arith.negf %200 : vector<2x32xf32>
    %202 = math.exp %201 : vector<2x32xf32>
    %cst_44 = arith.constant 1.000000e+00 : f32
    %203 = vector.broadcast %cst_44 : f32 to vector<2x32xf32>
    %204 = arith.addf %203, %202 : vector<2x32xf32>
    %205 = arith.divf %203, %204 : vector<2x32xf32>
    %206 = vector.extract_strided_slice %191 {offsets = [0, 64], sizes = [2, 32], strides = [1, 1]} : vector<2x128xf32> to vector<2x32xf32>
    %207 = math.tanh %206 : vector<2x32xf32>
    %208 = vector.extract_strided_slice %191 {offsets = [0, 96], sizes = [2, 32], strides = [1, 1]} : vector<2x128xf32> to vector<2x32xf32>
    %209 = arith.negf %208 : vector<2x32xf32>
    %210 = math.exp %209 : vector<2x32xf32>
    %cst_45 = arith.constant 1.000000e+00 : f32
    %211 = vector.broadcast %cst_45 : f32 to vector<2x32xf32>
    %212 = arith.addf %211, %210 : vector<2x32xf32>
    %213 = arith.divf %211, %212 : vector<2x32xf32>
    %214 = arith.mulf %205, %165 : vector<2x32xf32>
    %215 = arith.mulf %199, %207 : vector<2x32xf32>
    %216 = arith.addf %214, %215 : vector<2x32xf32>
    %217 = math.tanh %216 : vector<2x32xf32>
    %218 = arith.mulf %213, %217 : vector<2x32xf32>
    %219 = vector.extract_strided_slice %193 {offsets = [0, 0], sizes = [2, 32], strides = [1, 1]} : vector<2x128xf32> to vector<2x32xf32>
    %220 = arith.negf %219 : vector<2x32xf32>
    %221 = math.exp %220 : vector<2x32xf32>
    %cst_46 = arith.constant 1.000000e+00 : f32
    %222 = vector.broadcast %cst_46 : f32 to vector<2x32xf32>
    %223 = arith.addf %222, %221 : vector<2x32xf32>
    %224 = arith.divf %222, %223 : vector<2x32xf32>
    %225 = vector.extract_strided_slice %193 {offsets = [0, 32], sizes = [2, 32], strides = [1, 1]} : vector<2x128xf32> to vector<2x32xf32>
    %226 = arith.negf %225 : vector<2x32xf32>
    %227 = math.exp %226 : vector<2x32xf32>
    %cst_47 = arith.constant 1.000000e+00 : f32
    %228 = vector.broadcast %cst_47 : f32 to vector<2x32xf32>
    %229 = arith.addf %228, %227 : vector<2x32xf32>
    %230 = arith.divf %228, %229 : vector<2x32xf32>
    %231 = vector.extract_strided_slice %193 {offsets = [0, 64], sizes = [2, 32], strides = [1, 1]} : vector<2x128xf32> to vector<2x32xf32>
    %232 = math.tanh %231 : vector<2x32xf32>
    %233 = vector.extract_strided_slice %193 {offsets = [0, 96], sizes = [2, 32], strides = [1, 1]} : vector<2x128xf32> to vector<2x32xf32>
    %234 = arith.negf %233 : vector<2x32xf32>
    %235 = math.exp %234 : vector<2x32xf32>
    %cst_48 = arith.constant 1.000000e+00 : f32
    %236 = vector.broadcast %cst_48 : f32 to vector<2x32xf32>
    %237 = arith.addf %236, %235 : vector<2x32xf32>
    %238 = arith.divf %236, %237 : vector<2x32xf32>
    %239 = arith.mulf %230, %171 : vector<2x32xf32>
    %240 = arith.mulf %224, %232 : vector<2x32xf32>
    %241 = arith.addf %239, %240 : vector<2x32xf32>
    %242 = math.tanh %241 : vector<2x32xf32>
    %243 = arith.mulf %238, %242 : vector<2x32xf32>
    %c2_i32 = arith.constant 2 : i32
    %244 = vector.broadcast %c2_i32 : i32 to vector<2x1xi32>
    %245 = arith.cmpi sgt, %0, %244 : vector<2x1xi32>
    %c5_i32 = arith.constant 5 : i32
    %246 = vector.broadcast %c5_i32 : i32 to vector<2x1xi32>
    %247 = arith.cmpi sgt, %0, %246 : vector<2x1xi32>
    %248 = vector.shape_cast %245 : vector<2x1xi1> to vector<2x1xi1>
    %249 = vector.broadcast %248 : vector<2x1xi1> to vector<2x32xi1>
    %250 = arith.select %249, %218, %162 : vector<2x32xi1>, vector<2x32xf32>
    %251 = vector.shape_cast %245 : vector<2x1xi1> to vector<2x1xi1>
    %252 = vector.broadcast %251 : vector<2x1xi1> to vector<2x32xi1>
    %253 = arith.select %252, %216, %165 : vector<2x32xi1>, vector<2x32xf32>
    %254 = vector.shape_cast %247 : vector<2x1xi1> to vector<2x1xi1>
    %255 = vector.broadcast %254 : vector<2x1xi1> to vector<2x32xi1>
    %256 = arith.select %255, %243, %168 : vector<2x32xi1>, vector<2x32xf32>
    %257 = vector.shape_cast %247 : vector<2x1xi1> to vector<2x1xi1>
    %258 = vector.broadcast %257 : vector<2x1xi1> to vector<2x32xi1>
    %259 = arith.select %258, %241, %171 : vector<2x32xi1>, vector<2x32xf32>
    %cst_49 = arith.constant 0.000000e+00 : f32
    %260 = vector.shape_cast %245 : vector<2x1xi1> to vector<2x1xi1>
    %261 = vector.broadcast %260 : vector<2x1xi1> to vector<2x32xi1>
    %262 = vector.broadcast %cst_49 : f32 to vector<2x32xf32>
    %263 = arith.select %261, %218, %262 : vector<2x32xi1>, vector<2x32xf32>
    %c0_50 = arith.constant 0 : index
    %c2 = arith.constant 2 : index
    %c0_51 = arith.constant 0 : index
    %264 = vector.load %arg7[%c0_50, %c2, %c0_51] : memref<2x8x32xf32, #tpu.memory_space<vmem>>, vector<2x1x32xf32>
    %265 = vector.shape_cast %264 : vector<2x1x32xf32> to vector<2x32xf32>
    %266 = vector.shape_cast %263 : vector<2x32xf32> to vector<2x1x32xf32>
    tpu.vector_store %arg7[%c0_50, %c2, %c0_51], %266 {strides = array<i32>} : memref<2x8x32xf32, #tpu.memory_space<vmem>>, vector<2x1x32xf32>,
    %cst_52 = arith.constant 0.000000e+00 : f32
    %267 = vector.shape_cast %247 : vector<2x1xi1> to vector<2x1xi1>
    %268 = vector.broadcast %267 : vector<2x1xi1> to vector<2x32xi1>
    %269 = vector.broadcast %cst_52 : f32 to vector<2x32xf32>
    %270 = arith.select %268, %243, %269 : vector<2x32xi1>, vector<2x32xf32>
    %c0_53 = arith.constant 0 : index
    %c5 = arith.constant 5 : index
    %c0_54 = arith.constant 0 : index
    %271 = vector.load %arg8[%c0_53, %c5, %c0_54] : memref<2x8x32xf32, #tpu.memory_space<vmem>>, vector<2x1x32xf32>
    %272 = vector.shape_cast %271 : vector<2x1x32xf32> to vector<2x32xf32>
    %273 = vector.shape_cast %270 : vector<2x32xf32> to vector<2x1x32xf32>
    tpu.vector_store %arg8[%c0_53, %c5, %c0_54], %273 {strides = array<i32>} : memref<2x8x32xf32, #tpu.memory_space<vmem>>, vector<2x1x32xf32>,
    %274 = arith.truncf %250 : vector<2x32xf32> to vector<2x32xbf16>
    %cst_55 = arith.constant dense<0.000000e+00> : vector<2x128xf32>
    %275 = tpu.matmul %274, %7, %cst_55 {dimension_numbers = #tpu.dot_dimension_numbers<[1], [0], [0], [1], [0, 0, 1, 1], [], []>} : vector<2x32xbf16>, vector<32x128xbf16>, vector<2x128xf32> -> vector<2x128xf32>
    %276 = arith.truncf %256 : vector<2x32xf32> to vector<2x32xbf16>
    %cst_56 = arith.constant dense<0.000000e+00> : vector<2x128xf32>
    %277 = tpu.matmul %276, %8, %cst_56 {dimension_numbers = #tpu.dot_dimension_numbers<[1], [0], [0], [1], [0, 0, 1, 1], [], []>} : vector<2x32xbf16>, vector<32x128xbf16>, vector<2x128xf32> -> vector<2x128xf32>
    %278 = vector.extract_strided_slice %6 {offsets = [6, 0], sizes = [2, 128], strides = [1, 1]} : vector<16x256xf32> to vector<2x128xf32>
    %279 = arith.addf %278, %275 : vector<2x128xf32>
    %280 = vector.extract_strided_slice %6 {offsets = [8, 128], sizes = [2, 128], strides = [1, 1]} : vector<16x256xf32> to vector<2x128xf32>
    %281 = arith.addf %280, %277 : vector<2x128xf32>
    %282 = vector.extract_strided_slice %279 {offsets = [0, 0], sizes = [2, 32], strides = [1, 1]} : vector<2x128xf32> to vector<2x32xf32>
    %283 = arith.negf %282 : vector<2x32xf32>
    %284 = math.exp %283 : vector<2x32xf32>
    %cst_57 = arith.constant 1.000000e+00 : f32
    %285 = vector.broadcast %cst_57 : f32 to vector<2x32xf32>
    %286 = arith.addf %285, %284 : vector<2x32xf32>
    %287 = arith.divf %285, %286 : vector<2x32xf32>
    %288 = vector.extract_strided_slice %279 {offsets = [0, 32], sizes = [2, 32], strides = [1, 1]} : vector<2x128xf32> to vector<2x32xf32>
    %289 = arith.negf %288 : vector<2x32xf32>
    %290 = math.exp %289 : vector<2x32xf32>
    %cst_58 = arith.constant 1.000000e+00 : f32
    %291 = vector.broadcast %cst_58 : f32 to vector<2x32xf32>
    %292 = arith.addf %291, %290 : vector<2x32xf32>
    %293 = arith.divf %291, %292 : vector<2x32xf32>
    %294 = vector.extract_strided_slice %279 {offsets = [0, 64], sizes = [2, 32], strides = [1, 1]} : vector<2x128xf32> to vector<2x32xf32>
    %295 = math.tanh %294 : vector<2x32xf32>
    %296 = vector.extract_strided_slice %279 {offsets = [0, 96], sizes = [2, 32], strides = [1, 1]} : vector<2x128xf32> to vector<2x32xf32>
    %297 = arith.negf %296 : vector<2x32xf32>
    %298 = math.exp %297 : vector<2x32xf32>
    %cst_59 = arith.constant 1.000000e+00 : f32
    %299 = vector.broadcast %cst_59 : f32 to vector<2x32xf32>
    %300 = arith.addf %299, %298 : vector<2x32xf32>
    %301 = arith.divf %299, %300 : vector<2x32xf32>
    %302 = arith.mulf %293, %253 : vector<2x32xf32>
    %303 = arith.mulf %287, %295 : vector<2x32xf32>
    %304 = arith.addf %302, %303 : vector<2x32xf32>
    %305 = math.tanh %304 : vector<2x32xf32>
    %306 = arith.mulf %301, %305 : vector<2x32xf32>
    %307 = vector.extract_strided_slice %281 {offsets = [0, 0], sizes = [2, 32], strides = [1, 1]} : vector<2x128xf32> to vector<2x32xf32>
    %308 = arith.negf %307 : vector<2x32xf32>
    %309 = math.exp %308 : vector<2x32xf32>
    %cst_60 = arith.constant 1.000000e+00 : f32
    %310 = vector.broadcast %cst_60 : f32 to vector<2x32xf32>
    %311 = arith.addf %310, %309 : vector<2x32xf32>
    %312 = arith.divf %310, %311 : vector<2x32xf32>
    %313 = vector.extract_strided_slice %281 {offsets = [0, 32], sizes = [2, 32], strides = [1, 1]} : vector<2x128xf32> to vector<2x32xf32>
    %314 = arith.negf %313 : vector<2x32xf32>
    %315 = math.exp %314 : vector<2x32xf32>
    %cst_61 = arith.constant 1.000000e+00 : f32
    %316 = vector.broadcast %cst_61 : f32 to vector<2x32xf32>
    %317 = arith.addf %316, %315 : vector<2x32xf32>
    %318 = arith.divf %316, %317 : vector<2x32xf32>
    %319 = vector.extract_strided_slice %281 {offsets = [0, 64], sizes = [2, 32], strides = [1, 1]} : vector<2x128xf32> to vector<2x32xf32>
    %320 = math.tanh %319 : vector<2x32xf32>
    %321 = vector.extract_strided_slice %281 {offsets = [0, 96], sizes = [2, 32], strides = [1, 1]} : vector<2x128xf32> to vector<2x32xf32>
    %322 = arith.negf %321 : vector<2x32xf32>
    %323 = math.exp %322 : vector<2x32xf32>
    %cst_62 = arith.constant 1.000000e+00 : f32
    %324 = vector.broadcast %cst_62 : f32 to vector<2x32xf32>
    %325 = arith.addf %324, %323 : vector<2x32xf32>
    %326 = arith.divf %324, %325 : vector<2x32xf32>
    %327 = arith.mulf %318, %259 : vector<2x32xf32>
    %328 = arith.mulf %312, %320 : vector<2x32xf32>
    %329 = arith.addf %327, %328 : vector<2x32xf32>
    %330 = math.tanh %329 : vector<2x32xf32>
    %331 = arith.mulf %326, %330 : vector<2x32xf32>
    %c3_i32 = arith.constant 3 : i32
    %332 = vector.broadcast %c3_i32 : i32 to vector<2x1xi32>
    %333 = arith.cmpi sgt, %0, %332 : vector<2x1xi32>
    %c4_i32 = arith.constant 4 : i32
    %334 = vector.broadcast %c4_i32 : i32 to vector<2x1xi32>
    %335 = arith.cmpi sgt, %0, %334 : vector<2x1xi32>
    %336 = vector.shape_cast %333 : vector<2x1xi1> to vector<2x1xi1>
    %337 = vector.broadcast %336 : vector<2x1xi1> to vector<2x32xi1>
    %338 = arith.select %337, %306, %250 : vector<2x32xi1>, vector<2x32xf32>
    %339 = vector.shape_cast %333 : vector<2x1xi1> to vector<2x1xi1>
    %340 = vector.broadcast %339 : vector<2x1xi1> to vector<2x32xi1>
    %341 = arith.select %340, %304, %253 : vector<2x32xi1>, vector<2x32xf32>
    %342 = vector.shape_cast %335 : vector<2x1xi1> to vector<2x1xi1>
    %343 = vector.broadcast %342 : vector<2x1xi1> to vector<2x32xi1>
    %344 = arith.select %343, %331, %256 : vector<2x32xi1>, vector<2x32xf32>
    %345 = vector.shape_cast %335 : vector<2x1xi1> to vector<2x1xi1>
    %346 = vector.broadcast %345 : vector<2x1xi1> to vector<2x32xi1>
    %347 = arith.select %346, %329, %259 : vector<2x32xi1>, vector<2x32xf32>
    %cst_63 = arith.constant 0.000000e+00 : f32
    %348 = vector.shape_cast %333 : vector<2x1xi1> to vector<2x1xi1>
    %349 = vector.broadcast %348 : vector<2x1xi1> to vector<2x32xi1>
    %350 = vector.broadcast %cst_63 : f32 to vector<2x32xf32>
    %351 = arith.select %349, %306, %350 : vector<2x32xi1>, vector<2x32xf32>
    %c0_64 = arith.constant 0 : index
    %c3 = arith.constant 3 : index
    %c0_65 = arith.constant 0 : index
    %352 = vector.load %arg7[%c0_64, %c3, %c0_65] : memref<2x8x32xf32, #tpu.memory_space<vmem>>, vector<2x1x32xf32>
    %353 = vector.shape_cast %352 : vector<2x1x32xf32> to vector<2x32xf32>
    %354 = vector.shape_cast %351 : vector<2x32xf32> to vector<2x1x32xf32>
    tpu.vector_store %arg7[%c0_64, %c3, %c0_65], %354 {strides = array<i32>} : memref<2x8x32xf32, #tpu.memory_space<vmem>>, vector<2x1x32xf32>,
    %cst_66 = arith.constant 0.000000e+00 : f32
    %355 = vector.shape_cast %335 : vector<2x1xi1> to vector<2x1xi1>
    %356 = vector.broadcast %355 : vector<2x1xi1> to vector<2x32xi1>
    %357 = vector.broadcast %cst_66 : f32 to vector<2x32xf32>
    %358 = arith.select %356, %331, %357 : vector<2x32xi1>, vector<2x32xf32>
    %c0_67 = arith.constant 0 : index
    %c4 = arith.constant 4 : index
    %c0_68 = arith.constant 0 : index
    %359 = vector.load %arg8[%c0_67, %c4, %c0_68] : memref<2x8x32xf32, #tpu.memory_space<vmem>>, vector<2x1x32xf32>
    %360 = vector.shape_cast %359 : vector<2x1x32xf32> to vector<2x32xf32>
    %361 = vector.shape_cast %358 : vector<2x32xf32> to vector<2x1x32xf32>
    tpu.vector_store %arg8[%c0_67, %c4, %c0_68], %361 {strides = array<i32>} : memref<2x8x32xf32, #tpu.memory_space<vmem>>, vector<2x1x32xf32>,
    %362 = arith.truncf %338 : vector<2x32xf32> to vector<2x32xbf16>
    %cst_69 = arith.constant dense<0.000000e+00> : vector<2x128xf32>
    %363 = tpu.matmul %362, %7, %cst_69 {dimension_numbers = #tpu.dot_dimension_numbers<[1], [0], [0], [1], [0, 0, 1, 1], [], []>} : vector<2x32xbf16>, vector<32x128xbf16>, vector<2x128xf32> -> vector<2x128xf32>
    %364 = arith.truncf %344 : vector<2x32xf32> to vector<2x32xbf16>
    %cst_70 = arith.constant dense<0.000000e+00> : vector<2x128xf32>
    %365 = tpu.matmul %364, %8, %cst_70 {dimension_numbers = #tpu.dot_dimension_numbers<[1], [0], [0], [1], [0, 0, 1, 1], [], []>} : vector<2x32xbf16>, vector<32x128xbf16>, vector<2x128xf32> -> vector<2x128xf32>
    %366 = vector.extract_strided_slice %6 {offsets = [8, 0], sizes = [2, 128], strides = [1, 1]} : vector<16x256xf32> to vector<2x128xf32>
    %367 = arith.addf %366, %363 : vector<2x128xf32>
    %368 = vector.extract_strided_slice %6 {offsets = [6, 128], sizes = [2, 128], strides = [1, 1]} : vector<16x256xf32> to vector<2x128xf32>
    %369 = arith.addf %368, %365 : vector<2x128xf32>
    %370 = vector.extract_strided_slice %367 {offsets = [0, 0], sizes = [2, 32], strides = [1, 1]} : vector<2x128xf32> to vector<2x32xf32>
    %371 = arith.negf %370 : vector<2x32xf32>
    %372 = math.exp %371 : vector<2x32xf32>
    %cst_71 = arith.constant 1.000000e+00 : f32
    %373 = vector.broadcast %cst_71 : f32 to vector<2x32xf32>
    %374 = arith.addf %373, %372 : vector<2x32xf32>
    %375 = arith.divf %373, %374 : vector<2x32xf32>
    %376 = vector.extract_strided_slice %367 {offsets = [0, 32], sizes = [2, 32], strides = [1, 1]} : vector<2x128xf32> to vector<2x32xf32>
    %377 = arith.negf %376 : vector<2x32xf32>
    %378 = math.exp %377 : vector<2x32xf32>
    %cst_72 = arith.constant 1.000000e+00 : f32
    %379 = vector.broadcast %cst_72 : f32 to vector<2x32xf32>
    %380 = arith.addf %379, %378 : vector<2x32xf32>
    %381 = arith.divf %379, %380 : vector<2x32xf32>
    %382 = vector.extract_strided_slice %367 {offsets = [0, 64], sizes = [2, 32], strides = [1, 1]} : vector<2x128xf32> to vector<2x32xf32>
    %383 = math.tanh %382 : vector<2x32xf32>
    %384 = vector.extract_strided_slice %367 {offsets = [0, 96], sizes = [2, 32], strides = [1, 1]} : vector<2x128xf32> to vector<2x32xf32>
    %385 = arith.negf %384 : vector<2x32xf32>
    %386 = math.exp %385 : vector<2x32xf32>
    %cst_73 = arith.constant 1.000000e+00 : f32
    %387 = vector.broadcast %cst_73 : f32 to vector<2x32xf32>
    %388 = arith.addf %387, %386 : vector<2x32xf32>
    %389 = arith.divf %387, %388 : vector<2x32xf32>
    %390 = arith.mulf %381, %341 : vector<2x32xf32>
    %391 = arith.mulf %375, %383 : vector<2x32xf32>
    %392 = arith.addf %390, %391 : vector<2x32xf32>
    %393 = math.tanh %392 : vector<2x32xf32>
    %394 = arith.mulf %389, %393 : vector<2x32xf32>
    %395 = vector.extract_strided_slice %369 {offsets = [0, 0], sizes = [2, 32], strides = [1, 1]} : vector<2x128xf32> to vector<2x32xf32>
    %396 = arith.negf %395 : vector<2x32xf32>
    %397 = math.exp %396 : vector<2x32xf32>
    %cst_74 = arith.constant 1.000000e+00 : f32
    %398 = vector.broadcast %cst_74 : f32 to vector<2x32xf32>
    %399 = arith.addf %398, %397 : vector<2x32xf32>
    %400 = arith.divf %398, %399 : vector<2x32xf32>
    %401 = vector.extract_strided_slice %369 {offsets = [0, 32], sizes = [2, 32], strides = [1, 1]} : vector<2x128xf32> to vector<2x32xf32>
    %402 = arith.negf %401 : vector<2x32xf32>
    %403 = math.exp %402 : vector<2x32xf32>
    %cst_75 = arith.constant 1.000000e+00 : f32
    %404 = vector.broadcast %cst_75 : f32 to vector<2x32xf32>
    %405 = arith.addf %404, %403 : vector<2x32xf32>
    %406 = arith.divf %404, %405 : vector<2x32xf32>
    %407 = vector.extract_strided_slice %369 {offsets = [0, 64], sizes = [2, 32], strides = [1, 1]} : vector<2x128xf32> to vector<2x32xf32>
    %408 = math.tanh %407 : vector<2x32xf32>
    %409 = vector.extract_strided_slice %369 {offsets = [0, 96], sizes = [2, 32], strides = [1, 1]} : vector<2x128xf32> to vector<2x32xf32>
    %410 = arith.negf %409 : vector<2x32xf32>
    %411 = math.exp %410 : vector<2x32xf32>
    %cst_76 = arith.constant 1.000000e+00 : f32
    %412 = vector.broadcast %cst_76 : f32 to vector<2x32xf32>
    %413 = arith.addf %412, %411 : vector<2x32xf32>
    %414 = arith.divf %412, %413 : vector<2x32xf32>
    %415 = arith.mulf %406, %347 : vector<2x32xf32>
    %416 = arith.mulf %400, %408 : vector<2x32xf32>
    %417 = arith.addf %415, %416 : vector<2x32xf32>
    %418 = math.tanh %417 : vector<2x32xf32>
    %419 = arith.mulf %414, %418 : vector<2x32xf32>
    %c4_i32_77 = arith.constant 4 : i32
    %420 = vector.broadcast %c4_i32_77 : i32 to vector<2x1xi32>
    %421 = arith.cmpi sgt, %0, %420 : vector<2x1xi32>
    %c3_i32_78 = arith.constant 3 : i32
    %422 = vector.broadcast %c3_i32_78 : i32 to vector<2x1xi32>
    %423 = arith.cmpi sgt, %0, %422 : vector<2x1xi32>
    %424 = vector.shape_cast %421 : vector<2x1xi1> to vector<2x1xi1>
    %425 = vector.broadcast %424 : vector<2x1xi1> to vector<2x32xi1>
    %426 = arith.select %425, %394, %338 : vector<2x32xi1>, vector<2x32xf32>
    %427 = vector.shape_cast %421 : vector<2x1xi1> to vector<2x1xi1>
    %428 = vector.broadcast %427 : vector<2x1xi1> to vector<2x32xi1>
    %429 = arith.select %428, %392, %341 : vector<2x32xi1>, vector<2x32xf32>
    %430 = vector.shape_cast %423 : vector<2x1xi1> to vector<2x1xi1>
    %431 = vector.broadcast %430 : vector<2x1xi1> to vector<2x32xi1>
    %432 = arith.select %431, %419, %344 : vector<2x32xi1>, vector<2x32xf32>
    %433 = vector.shape_cast %423 : vector<2x1xi1> to vector<2x1xi1>
    %434 = vector.broadcast %433 : vector<2x1xi1> to vector<2x32xi1>
    %435 = arith.select %434, %417, %347 : vector<2x32xi1>, vector<2x32xf32>
    %cst_79 = arith.constant 0.000000e+00 : f32
    %436 = vector.shape_cast %421 : vector<2x1xi1> to vector<2x1xi1>
    %437 = vector.broadcast %436 : vector<2x1xi1> to vector<2x32xi1>
    %438 = vector.broadcast %cst_79 : f32 to vector<2x32xf32>
    %439 = arith.select %437, %394, %438 : vector<2x32xi1>, vector<2x32xf32>
    %c0_80 = arith.constant 0 : index
    %c4_81 = arith.constant 4 : index
    %c0_82 = arith.constant 0 : index
    %440 = vector.load %arg7[%c0_80, %c4_81, %c0_82] : memref<2x8x32xf32, #tpu.memory_space<vmem>>, vector<2x1x32xf32>
    %441 = vector.shape_cast %440 : vector<2x1x32xf32> to vector<2x32xf32>
    %442 = vector.shape_cast %439 : vector<2x32xf32> to vector<2x1x32xf32>
    tpu.vector_store %arg7[%c0_80, %c4_81, %c0_82], %442 {strides = array<i32>} : memref<2x8x32xf32, #tpu.memory_space<vmem>>, vector<2x1x32xf32>,
    %cst_83 = arith.constant 0.000000e+00 : f32
    %443 = vector.shape_cast %423 : vector<2x1xi1> to vector<2x1xi1>
    %444 = vector.broadcast %443 : vector<2x1xi1> to vector<2x32xi1>
    %445 = vector.broadcast %cst_83 : f32 to vector<2x32xf32>
    %446 = arith.select %444, %419, %445 : vector<2x32xi1>, vector<2x32xf32>
    %c0_84 = arith.constant 0 : index
    %c3_85 = arith.constant 3 : index
    %c0_86 = arith.constant 0 : index
    %447 = vector.load %arg8[%c0_84, %c3_85, %c0_86] : memref<2x8x32xf32, #tpu.memory_space<vmem>>, vector<2x1x32xf32>
    %448 = vector.shape_cast %447 : vector<2x1x32xf32> to vector<2x32xf32>
    %449 = vector.shape_cast %446 : vector<2x32xf32> to vector<2x1x32xf32>
    tpu.vector_store %arg8[%c0_84, %c3_85, %c0_86], %449 {strides = array<i32>} : memref<2x8x32xf32, #tpu.memory_space<vmem>>, vector<2x1x32xf32>,
    %450 = arith.truncf %426 : vector<2x32xf32> to vector<2x32xbf16>
    %cst_87 = arith.constant dense<0.000000e+00> : vector<2x128xf32>
    %451 = tpu.matmul %450, %7, %cst_87 {dimension_numbers = #tpu.dot_dimension_numbers<[1], [0], [0], [1], [0, 0, 1, 1], [], []>} : vector<2x32xbf16>, vector<32x128xbf16>, vector<2x128xf32> -> vector<2x128xf32>
    %452 = arith.truncf %432 : vector<2x32xf32> to vector<2x32xbf16>
    %cst_88 = arith.constant dense<0.000000e+00> : vector<2x128xf32>
    %453 = tpu.matmul %452, %8, %cst_88 {dimension_numbers = #tpu.dot_dimension_numbers<[1], [0], [0], [1], [0, 0, 1, 1], [], []>} : vector<2x32xbf16>, vector<32x128xbf16>, vector<2x128xf32> -> vector<2x128xf32>
    %454 = vector.extract_strided_slice %6 {offsets = [10, 0], sizes = [2, 128], strides = [1, 1]} : vector<16x256xf32> to vector<2x128xf32>
    %455 = arith.addf %454, %451 : vector<2x128xf32>
    %456 = vector.extract_strided_slice %6 {offsets = [4, 128], sizes = [2, 128], strides = [1, 1]} : vector<16x256xf32> to vector<2x128xf32>
    %457 = arith.addf %456, %453 : vector<2x128xf32>
    %458 = vector.extract_strided_slice %455 {offsets = [0, 0], sizes = [2, 32], strides = [1, 1]} : vector<2x128xf32> to vector<2x32xf32>
    %459 = arith.negf %458 : vector<2x32xf32>
    %460 = math.exp %459 : vector<2x32xf32>
    %cst_89 = arith.constant 1.000000e+00 : f32
    %461 = vector.broadcast %cst_89 : f32 to vector<2x32xf32>
    %462 = arith.addf %461, %460 : vector<2x32xf32>
    %463 = arith.divf %461, %462 : vector<2x32xf32>
    %464 = vector.extract_strided_slice %455 {offsets = [0, 32], sizes = [2, 32], strides = [1, 1]} : vector<2x128xf32> to vector<2x32xf32>
    %465 = arith.negf %464 : vector<2x32xf32>
    %466 = math.exp %465 : vector<2x32xf32>
    %cst_90 = arith.constant 1.000000e+00 : f32
    %467 = vector.broadcast %cst_90 : f32 to vector<2x32xf32>
    %468 = arith.addf %467, %466 : vector<2x32xf32>
    %469 = arith.divf %467, %468 : vector<2x32xf32>
    %470 = vector.extract_strided_slice %455 {offsets = [0, 64], sizes = [2, 32], strides = [1, 1]} : vector<2x128xf32> to vector<2x32xf32>
    %471 = math.tanh %470 : vector<2x32xf32>
    %472 = vector.extract_strided_slice %455 {offsets = [0, 96], sizes = [2, 32], strides = [1, 1]} : vector<2x128xf32> to vector<2x32xf32>
    %473 = arith.negf %472 : vector<2x32xf32>
    %474 = math.exp %473 : vector<2x32xf32>
    %cst_91 = arith.constant 1.000000e+00 : f32
    %475 = vector.broadcast %cst_91 : f32 to vector<2x32xf32>
    %476 = arith.addf %475, %474 : vector<2x32xf32>
    %477 = arith.divf %475, %476 : vector<2x32xf32>
    %478 = arith.mulf %469, %429 : vector<2x32xf32>
    %479 = arith.mulf %463, %471 : vector<2x32xf32>
    %480 = arith.addf %478, %479 : vector<2x32xf32>
    %481 = math.tanh %480 : vector<2x32xf32>
    %482 = arith.mulf %477, %481 : vector<2x32xf32>
    %483 = vector.extract_strided_slice %457 {offsets = [0, 0], sizes = [2, 32], strides = [1, 1]} : vector<2x128xf32> to vector<2x32xf32>
    %484 = arith.negf %483 : vector<2x32xf32>
    %485 = math.exp %484 : vector<2x32xf32>
    %cst_92 = arith.constant 1.000000e+00 : f32
    %486 = vector.broadcast %cst_92 : f32 to vector<2x32xf32>
    %487 = arith.addf %486, %485 : vector<2x32xf32>
    %488 = arith.divf %486, %487 : vector<2x32xf32>
    %489 = vector.extract_strided_slice %457 {offsets = [0, 32], sizes = [2, 32], strides = [1, 1]} : vector<2x128xf32> to vector<2x32xf32>
    %490 = arith.negf %489 : vector<2x32xf32>
    %491 = math.exp %490 : vector<2x32xf32>
    %cst_93 = arith.constant 1.000000e+00 : f32
    %492 = vector.broadcast %cst_93 : f32 to vector<2x32xf32>
    %493 = arith.addf %492, %491 : vector<2x32xf32>
    %494 = arith.divf %492, %493 : vector<2x32xf32>
    %495 = vector.extract_strided_slice %457 {offsets = [0, 64], sizes = [2, 32], strides = [1, 1]} : vector<2x128xf32> to vector<2x32xf32>
    %496 = math.tanh %495 : vector<2x32xf32>
    %497 = vector.extract_strided_slice %457 {offsets = [0, 96], sizes = [2, 32], strides = [1, 1]} : vector<2x128xf32> to vector<2x32xf32>
    %498 = arith.negf %497 : vector<2x32xf32>
    %499 = math.exp %498 : vector<2x32xf32>
    %cst_94 = arith.constant 1.000000e+00 : f32
    %500 = vector.broadcast %cst_94 : f32 to vector<2x32xf32>
    %501 = arith.addf %500, %499 : vector<2x32xf32>
    %502 = arith.divf %500, %501 : vector<2x32xf32>
    %503 = arith.mulf %494, %435 : vector<2x32xf32>
    %504 = arith.mulf %488, %496 : vector<2x32xf32>
    %505 = arith.addf %503, %504 : vector<2x32xf32>
    %506 = math.tanh %505 : vector<2x32xf32>
    %507 = arith.mulf %502, %506 : vector<2x32xf32>
    %c5_i32_95 = arith.constant 5 : i32
    %508 = vector.broadcast %c5_i32_95 : i32 to vector<2x1xi32>
    %509 = arith.cmpi sgt, %0, %508 : vector<2x1xi32>
    %c2_i32_96 = arith.constant 2 : i32
    %510 = vector.broadcast %c2_i32_96 : i32 to vector<2x1xi32>
    %511 = arith.cmpi sgt, %0, %510 : vector<2x1xi32>
    %512 = vector.shape_cast %509 : vector<2x1xi1> to vector<2x1xi1>
    %513 = vector.broadcast %512 : vector<2x1xi1> to vector<2x32xi1>
    %514 = arith.select %513, %482, %426 : vector<2x32xi1>, vector<2x32xf32>
    %515 = vector.shape_cast %509 : vector<2x1xi1> to vector<2x1xi1>
    %516 = vector.broadcast %515 : vector<2x1xi1> to vector<2x32xi1>
    %517 = arith.select %516, %480, %429 : vector<2x32xi1>, vector<2x32xf32>
    %518 = vector.shape_cast %511 : vector<2x1xi1> to vector<2x1xi1>
    %519 = vector.broadcast %518 : vector<2x1xi1> to vector<2x32xi1>
    %520 = arith.select %519, %507, %432 : vector<2x32xi1>, vector<2x32xf32>
    %521 = vector.shape_cast %511 : vector<2x1xi1> to vector<2x1xi1>
    %522 = vector.broadcast %521 : vector<2x1xi1> to vector<2x32xi1>
    %523 = arith.select %522, %505, %435 : vector<2x32xi1>, vector<2x32xf32>
    %cst_97 = arith.constant 0.000000e+00 : f32
    %524 = vector.shape_cast %509 : vector<2x1xi1> to vector<2x1xi1>
    %525 = vector.broadcast %524 : vector<2x1xi1> to vector<2x32xi1>
    %526 = vector.broadcast %cst_97 : f32 to vector<2x32xf32>
    %527 = arith.select %525, %482, %526 : vector<2x32xi1>, vector<2x32xf32>
    %c0_98 = arith.constant 0 : index
    %c5_99 = arith.constant 5 : index
    %c0_100 = arith.constant 0 : index
    %528 = vector.load %arg7[%c0_98, %c5_99, %c0_100] : memref<2x8x32xf32, #tpu.memory_space<vmem>>, vector<2x1x32xf32>
    %529 = vector.shape_cast %528 : vector<2x1x32xf32> to vector<2x32xf32>
    %530 = vector.shape_cast %527 : vector<2x32xf32> to vector<2x1x32xf32>
    tpu.vector_store %arg7[%c0_98, %c5_99, %c0_100], %530 {strides = array<i32>} : memref<2x8x32xf32, #tpu.memory_space<vmem>>, vector<2x1x32xf32>,
    %cst_101 = arith.constant 0.000000e+00 : f32
    %531 = vector.shape_cast %511 : vector<2x1xi1> to vector<2x1xi1>
    %532 = vector.broadcast %531 : vector<2x1xi1> to vector<2x32xi1>
    %533 = vector.broadcast %cst_101 : f32 to vector<2x32xf32>
    %534 = arith.select %532, %507, %533 : vector<2x32xi1>, vector<2x32xf32>
    %c0_102 = arith.constant 0 : index
    %c2_103 = arith.constant 2 : index
    %c0_104 = arith.constant 0 : index
    %535 = vector.load %arg8[%c0_102, %c2_103, %c0_104] : memref<2x8x32xf32, #tpu.memory_space<vmem>>, vector<2x1x32xf32>
    %536 = vector.shape_cast %535 : vector<2x1x32xf32> to vector<2x32xf32>
    %537 = vector.shape_cast %534 : vector<2x32xf32> to vector<2x1x32xf32>
    tpu.vector_store %arg8[%c0_102, %c2_103, %c0_104], %537 {strides = array<i32>} : memref<2x8x32xf32, #tpu.memory_space<vmem>>, vector<2x1x32xf32>,
    %538 = arith.truncf %514 : vector<2x32xf32> to vector<2x32xbf16>
    %cst_105 = arith.constant dense<0.000000e+00> : vector<2x128xf32>
    %539 = tpu.matmul %538, %7, %cst_105 {dimension_numbers = #tpu.dot_dimension_numbers<[1], [0], [0], [1], [0, 0, 1, 1], [], []>} : vector<2x32xbf16>, vector<32x128xbf16>, vector<2x128xf32> -> vector<2x128xf32>
    %540 = arith.truncf %520 : vector<2x32xf32> to vector<2x32xbf16>
    %cst_106 = arith.constant dense<0.000000e+00> : vector<2x128xf32>
    %541 = tpu.matmul %540, %8, %cst_106 {dimension_numbers = #tpu.dot_dimension_numbers<[1], [0], [0], [1], [0, 0, 1, 1], [], []>} : vector<2x32xbf16>, vector<32x128xbf16>, vector<2x128xf32> -> vector<2x128xf32>
    %542 = vector.extract_strided_slice %6 {offsets = [12, 0], sizes = [2, 128], strides = [1, 1]} : vector<16x256xf32> to vector<2x128xf32>
    %543 = arith.addf %542, %539 : vector<2x128xf32>
    %544 = vector.extract_strided_slice %6 {offsets = [2, 128], sizes = [2, 128], strides = [1, 1]} : vector<16x256xf32> to vector<2x128xf32>
    %545 = arith.addf %544, %541 : vector<2x128xf32>
    %546 = vector.extract_strided_slice %543 {offsets = [0, 0], sizes = [2, 32], strides = [1, 1]} : vector<2x128xf32> to vector<2x32xf32>
    %547 = arith.negf %546 : vector<2x32xf32>
    %548 = math.exp %547 : vector<2x32xf32>
    %cst_107 = arith.constant 1.000000e+00 : f32
    %549 = vector.broadcast %cst_107 : f32 to vector<2x32xf32>
    %550 = arith.addf %549, %548 : vector<2x32xf32>
    %551 = arith.divf %549, %550 : vector<2x32xf32>
    %552 = vector.extract_strided_slice %543 {offsets = [0, 32], sizes = [2, 32], strides = [1, 1]} : vector<2x128xf32> to vector<2x32xf32>
    %553 = arith.negf %552 : vector<2x32xf32>
    %554 = math.exp %553 : vector<2x32xf32>
    %cst_108 = arith.constant 1.000000e+00 : f32
    %555 = vector.broadcast %cst_108 : f32 to vector<2x32xf32>
    %556 = arith.addf %555, %554 : vector<2x32xf32>
    %557 = arith.divf %555, %556 : vector<2x32xf32>
    %558 = vector.extract_strided_slice %543 {offsets = [0, 64], sizes = [2, 32], strides = [1, 1]} : vector<2x128xf32> to vector<2x32xf32>
    %559 = math.tanh %558 : vector<2x32xf32>
    %560 = vector.extract_strided_slice %543 {offsets = [0, 96], sizes = [2, 32], strides = [1, 1]} : vector<2x128xf32> to vector<2x32xf32>
    %561 = arith.negf %560 : vector<2x32xf32>
    %562 = math.exp %561 : vector<2x32xf32>
    %cst_109 = arith.constant 1.000000e+00 : f32
    %563 = vector.broadcast %cst_109 : f32 to vector<2x32xf32>
    %564 = arith.addf %563, %562 : vector<2x32xf32>
    %565 = arith.divf %563, %564 : vector<2x32xf32>
    %566 = arith.mulf %557, %517 : vector<2x32xf32>
    %567 = arith.mulf %551, %559 : vector<2x32xf32>
    %568 = arith.addf %566, %567 : vector<2x32xf32>
    %569 = math.tanh %568 : vector<2x32xf32>
    %570 = arith.mulf %565, %569 : vector<2x32xf32>
    %571 = vector.extract_strided_slice %545 {offsets = [0, 0], sizes = [2, 32], strides = [1, 1]} : vector<2x128xf32> to vector<2x32xf32>
    %572 = arith.negf %571 : vector<2x32xf32>
    %573 = math.exp %572 : vector<2x32xf32>
    %cst_110 = arith.constant 1.000000e+00 : f32
    %574 = vector.broadcast %cst_110 : f32 to vector<2x32xf32>
    %575 = arith.addf %574, %573 : vector<2x32xf32>
    %576 = arith.divf %574, %575 : vector<2x32xf32>
    %577 = vector.extract_strided_slice %545 {offsets = [0, 32], sizes = [2, 32], strides = [1, 1]} : vector<2x128xf32> to vector<2x32xf32>
    %578 = arith.negf %577 : vector<2x32xf32>
    %579 = math.exp %578 : vector<2x32xf32>
    %cst_111 = arith.constant 1.000000e+00 : f32
    %580 = vector.broadcast %cst_111 : f32 to vector<2x32xf32>
    %581 = arith.addf %580, %579 : vector<2x32xf32>
    %582 = arith.divf %580, %581 : vector<2x32xf32>
    %583 = vector.extract_strided_slice %545 {offsets = [0, 64], sizes = [2, 32], strides = [1, 1]} : vector<2x128xf32> to vector<2x32xf32>
    %584 = math.tanh %583 : vector<2x32xf32>
    %585 = vector.extract_strided_slice %545 {offsets = [0, 96], sizes = [2, 32], strides = [1, 1]} : vector<2x128xf32> to vector<2x32xf32>
    %586 = arith.negf %585 : vector<2x32xf32>
    %587 = math.exp %586 : vector<2x32xf32>
    %cst_112 = arith.constant 1.000000e+00 : f32
    %588 = vector.broadcast %cst_112 : f32 to vector<2x32xf32>
    %589 = arith.addf %588, %587 : vector<2x32xf32>
    %590 = arith.divf %588, %589 : vector<2x32xf32>
    %591 = arith.mulf %582, %523 : vector<2x32xf32>
    %592 = arith.mulf %576, %584 : vector<2x32xf32>
    %593 = arith.addf %591, %592 : vector<2x32xf32>
    %594 = math.tanh %593 : vector<2x32xf32>
    %595 = arith.mulf %590, %594 : vector<2x32xf32>
    %c6_i32_113 = arith.constant 6 : i32
    %596 = vector.broadcast %c6_i32_113 : i32 to vector<2x1xi32>
    %597 = arith.cmpi sgt, %0, %596 : vector<2x1xi32>
    %c1_i32_114 = arith.constant 1 : i32
    %598 = vector.broadcast %c1_i32_114 : i32 to vector<2x1xi32>
    %599 = arith.cmpi sgt, %0, %598 : vector<2x1xi32>
    %600 = vector.shape_cast %597 : vector<2x1xi1> to vector<2x1xi1>
    %601 = vector.broadcast %600 : vector<2x1xi1> to vector<2x32xi1>
    %602 = arith.select %601, %570, %514 : vector<2x32xi1>, vector<2x32xf32>
    %603 = vector.shape_cast %597 : vector<2x1xi1> to vector<2x1xi1>
    %604 = vector.broadcast %603 : vector<2x1xi1> to vector<2x32xi1>
    %605 = arith.select %604, %568, %517 : vector<2x32xi1>, vector<2x32xf32>
    %606 = vector.shape_cast %599 : vector<2x1xi1> to vector<2x1xi1>
    %607 = vector.broadcast %606 : vector<2x1xi1> to vector<2x32xi1>
    %608 = arith.select %607, %595, %520 : vector<2x32xi1>, vector<2x32xf32>
    %609 = vector.shape_cast %599 : vector<2x1xi1> to vector<2x1xi1>
    %610 = vector.broadcast %609 : vector<2x1xi1> to vector<2x32xi1>
    %611 = arith.select %610, %593, %523 : vector<2x32xi1>, vector<2x32xf32>
    %cst_115 = arith.constant 0.000000e+00 : f32
    %612 = vector.shape_cast %597 : vector<2x1xi1> to vector<2x1xi1>
    %613 = vector.broadcast %612 : vector<2x1xi1> to vector<2x32xi1>
    %614 = vector.broadcast %cst_115 : f32 to vector<2x32xf32>
    %615 = arith.select %613, %570, %614 : vector<2x32xi1>, vector<2x32xf32>
    %c0_116 = arith.constant 0 : index
    %c6_117 = arith.constant 6 : index
    %c0_118 = arith.constant 0 : index
    %616 = vector.load %arg7[%c0_116, %c6_117, %c0_118] : memref<2x8x32xf32, #tpu.memory_space<vmem>>, vector<2x1x32xf32>
    %617 = vector.shape_cast %616 : vector<2x1x32xf32> to vector<2x32xf32>
    %618 = vector.shape_cast %615 : vector<2x32xf32> to vector<2x1x32xf32>
    tpu.vector_store %arg7[%c0_116, %c6_117, %c0_118], %618 {strides = array<i32>} : memref<2x8x32xf32, #tpu.memory_space<vmem>>, vector<2x1x32xf32>,
    %cst_119 = arith.constant 0.000000e+00 : f32
    %619 = vector.shape_cast %599 : vector<2x1xi1> to vector<2x1xi1>
    %620 = vector.broadcast %619 : vector<2x1xi1> to vector<2x32xi1>
    %621 = vector.broadcast %cst_119 : f32 to vector<2x32xf32>
    %622 = arith.select %620, %595, %621 : vector<2x32xi1>, vector<2x32xf32>
    %c0_120 = arith.constant 0 : index
    %c1_121 = arith.constant 1 : index
    %c0_122 = arith.constant 0 : index
    %623 = vector.load %arg8[%c0_120, %c1_121, %c0_122] : memref<2x8x32xf32, #tpu.memory_space<vmem>>, vector<2x1x32xf32>
    %624 = vector.shape_cast %623 : vector<2x1x32xf32> to vector<2x32xf32>
    %625 = vector.shape_cast %622 : vector<2x32xf32> to vector<2x1x32xf32>
    tpu.vector_store %arg8[%c0_120, %c1_121, %c0_122], %625 {strides = array<i32>} : memref<2x8x32xf32, #tpu.memory_space<vmem>>, vector<2x1x32xf32>,
    %626 = arith.truncf %602 : vector<2x32xf32> to vector<2x32xbf16>
    %cst_123 = arith.constant dense<0.000000e+00> : vector<2x128xf32>
    %627 = tpu.matmul %626, %7, %cst_123 {dimension_numbers = #tpu.dot_dimension_numbers<[1], [0], [0], [1], [0, 0, 1, 1], [], []>} : vector<2x32xbf16>, vector<32x128xbf16>, vector<2x128xf32> -> vector<2x128xf32>
    %628 = arith.truncf %608 : vector<2x32xf32> to vector<2x32xbf16>
    %cst_124 = arith.constant dense<0.000000e+00> : vector<2x128xf32>
    %629 = tpu.matmul %628, %8, %cst_124 {dimension_numbers = #tpu.dot_dimension_numbers<[1], [0], [0], [1], [0, 0, 1, 1], [], []>} : vector<2x32xbf16>, vector<32x128xbf16>, vector<2x128xf32> -> vector<2x128xf32>
    %630 = vector.extract_strided_slice %6 {offsets = [14, 0], sizes = [2, 128], strides = [1, 1]} : vector<16x256xf32> to vector<2x128xf32>
    %631 = arith.addf %630, %627 : vector<2x128xf32>
    %632 = vector.extract_strided_slice %6 {offsets = [0, 128], sizes = [2, 128], strides = [1, 1]} : vector<16x256xf32> to vector<2x128xf32>
    %633 = arith.addf %632, %629 : vector<2x128xf32>
    %634 = vector.extract_strided_slice %631 {offsets = [0, 0], sizes = [2, 32], strides = [1, 1]} : vector<2x128xf32> to vector<2x32xf32>
    %635 = arith.negf %634 : vector<2x32xf32>
    %636 = math.exp %635 : vector<2x32xf32>
    %cst_125 = arith.constant 1.000000e+00 : f32
    %637 = vector.broadcast %cst_125 : f32 to vector<2x32xf32>
    %638 = arith.addf %637, %636 : vector<2x32xf32>
    %639 = arith.divf %637, %638 : vector<2x32xf32>
    %640 = vector.extract_strided_slice %631 {offsets = [0, 32], sizes = [2, 32], strides = [1, 1]} : vector<2x128xf32> to vector<2x32xf32>
    %641 = arith.negf %640 : vector<2x32xf32>
    %642 = math.exp %641 : vector<2x32xf32>
    %cst_126 = arith.constant 1.000000e+00 : f32
    %643 = vector.broadcast %cst_126 : f32 to vector<2x32xf32>
    %644 = arith.addf %643, %642 : vector<2x32xf32>
    %645 = arith.divf %643, %644 : vector<2x32xf32>
    %646 = vector.extract_strided_slice %631 {offsets = [0, 64], sizes = [2, 32], strides = [1, 1]} : vector<2x128xf32> to vector<2x32xf32>
    %647 = math.tanh %646 : vector<2x32xf32>
    %648 = vector.extract_strided_slice %631 {offsets = [0, 96], sizes = [2, 32], strides = [1, 1]} : vector<2x128xf32> to vector<2x32xf32>
    %649 = arith.negf %648 : vector<2x32xf32>
    %650 = math.exp %649 : vector<2x32xf32>
    %cst_127 = arith.constant 1.000000e+00 : f32
    %651 = vector.broadcast %cst_127 : f32 to vector<2x32xf32>
    %652 = arith.addf %651, %650 : vector<2x32xf32>
    %653 = arith.divf %651, %652 : vector<2x32xf32>
    %654 = arith.mulf %645, %605 : vector<2x32xf32>
    %655 = arith.mulf %639, %647 : vector<2x32xf32>
    %656 = arith.addf %654, %655 : vector<2x32xf32>
    %657 = math.tanh %656 : vector<2x32xf32>
    %658 = arith.mulf %653, %657 : vector<2x32xf32>
    %659 = vector.extract_strided_slice %633 {offsets = [0, 0], sizes = [2, 32], strides = [1, 1]} : vector<2x128xf32> to vector<2x32xf32>
    %660 = arith.negf %659 : vector<2x32xf32>
    %661 = math.exp %660 : vector<2x32xf32>
    %cst_128 = arith.constant 1.000000e+00 : f32
    %662 = vector.broadcast %cst_128 : f32 to vector<2x32xf32>
    %663 = arith.addf %662, %661 : vector<2x32xf32>
    %664 = arith.divf %662, %663 : vector<2x32xf32>
    %665 = vector.extract_strided_slice %633 {offsets = [0, 32], sizes = [2, 32], strides = [1, 1]} : vector<2x128xf32> to vector<2x32xf32>
    %666 = arith.negf %665 : vector<2x32xf32>
    %667 = math.exp %666 : vector<2x32xf32>
    %cst_129 = arith.constant 1.000000e+00 : f32
    %668 = vector.broadcast %cst_129 : f32 to vector<2x32xf32>
    %669 = arith.addf %668, %667 : vector<2x32xf32>
    %670 = arith.divf %668, %669 : vector<2x32xf32>
    %671 = vector.extract_strided_slice %633 {offsets = [0, 64], sizes = [2, 32], strides = [1, 1]} : vector<2x128xf32> to vector<2x32xf32>
    %672 = math.tanh %671 : vector<2x32xf32>
    %673 = vector.extract_strided_slice %633 {offsets = [0, 96], sizes = [2, 32], strides = [1, 1]} : vector<2x128xf32> to vector<2x32xf32>
    %674 = arith.negf %673 : vector<2x32xf32>
    %675 = math.exp %674 : vector<2x32xf32>
    %cst_130 = arith.constant 1.000000e+00 : f32
    %676 = vector.broadcast %cst_130 : f32 to vector<2x32xf32>
    %677 = arith.addf %676, %675 : vector<2x32xf32>
    %678 = arith.divf %676, %677 : vector<2x32xf32>
    %679 = arith.mulf %670, %611 : vector<2x32xf32>
    %680 = arith.mulf %664, %672 : vector<2x32xf32>
    %681 = arith.addf %679, %680 : vector<2x32xf32>
    %682 = math.tanh %681 : vector<2x32xf32>
    %683 = arith.mulf %678, %682 : vector<2x32xf32>
    %c7_i32_131 = arith.constant 7 : i32
    %684 = vector.broadcast %c7_i32_131 : i32 to vector<2x1xi32>
    %685 = arith.cmpi sgt, %0, %684 : vector<2x1xi32>
    %c0_i32_132 = arith.constant 0 : i32
    %686 = vector.broadcast %c0_i32_132 : i32 to vector<2x1xi32>
    %687 = arith.cmpi sgt, %0, %686 : vector<2x1xi32>
    %688 = vector.shape_cast %685 : vector<2x1xi1> to vector<2x1xi1>
    %689 = vector.broadcast %688 : vector<2x1xi1> to vector<2x32xi1>
    %690 = arith.select %689, %658, %602 : vector<2x32xi1>, vector<2x32xf32>
    %691 = vector.shape_cast %685 : vector<2x1xi1> to vector<2x1xi1>
    %692 = vector.broadcast %691 : vector<2x1xi1> to vector<2x32xi1>
    %693 = arith.select %692, %656, %605 : vector<2x32xi1>, vector<2x32xf32>
    %694 = vector.shape_cast %687 : vector<2x1xi1> to vector<2x1xi1>
    %695 = vector.broadcast %694 : vector<2x1xi1> to vector<2x32xi1>
    %696 = arith.select %695, %683, %608 : vector<2x32xi1>, vector<2x32xf32>
    %697 = vector.shape_cast %687 : vector<2x1xi1> to vector<2x1xi1>
    %698 = vector.broadcast %697 : vector<2x1xi1> to vector<2x32xi1>
    %699 = arith.select %698, %681, %611 : vector<2x32xi1>, vector<2x32xf32>
    %cst_133 = arith.constant 0.000000e+00 : f32
    %700 = vector.shape_cast %685 : vector<2x1xi1> to vector<2x1xi1>
    %701 = vector.broadcast %700 : vector<2x1xi1> to vector<2x32xi1>
    %702 = vector.broadcast %cst_133 : f32 to vector<2x32xf32>
    %703 = arith.select %701, %658, %702 : vector<2x32xi1>, vector<2x32xf32>
    %c0_134 = arith.constant 0 : index
    %c7_135 = arith.constant 7 : index
    %c0_136 = arith.constant 0 : index
    %704 = vector.load %arg7[%c0_134, %c7_135, %c0_136] : memref<2x8x32xf32, #tpu.memory_space<vmem>>, vector<2x1x32xf32>
    %705 = vector.shape_cast %704 : vector<2x1x32xf32> to vector<2x32xf32>
    %706 = vector.shape_cast %703 : vector<2x32xf32> to vector<2x1x32xf32>
    tpu.vector_store %arg7[%c0_134, %c7_135, %c0_136], %706 {strides = array<i32>} : memref<2x8x32xf32, #tpu.memory_space<vmem>>, vector<2x1x32xf32>,
    %cst_137 = arith.constant 0.000000e+00 : f32
    %707 = vector.shape_cast %687 : vector<2x1xi1> to vector<2x1xi1>
    %708 = vector.broadcast %707 : vector<2x1xi1> to vector<2x32xi1>
    %709 = vector.broadcast %cst_137 : f32 to vector<2x32xf32>
    %710 = arith.select %708, %683, %709 : vector<2x32xi1>, vector<2x32xf32>
    %c0_138 = arith.constant 0 : index
    %c0_139 = arith.constant 0 : index
    %c0_140 = arith.constant 0 : index
    %711 = vector.load %arg8[%c0_138, %c0_139, %c0_140] : memref<2x8x32xf32, #tpu.memory_space<vmem>>, vector<2x1x32xf32>
    %712 = vector.shape_cast %711 : vector<2x1x32xf32> to vector<2x32xf32>
    %713 = vector.shape_cast %710 : vector<2x32xf32> to vector<2x1x32xf32>
    tpu.vector_store %arg8[%c0_138, %c0_139, %c0_140], %713 {strides = array<i32>} : memref<2x8x32xf32, #tpu.memory_space<vmem>>, vector<2x1x32xf32>,
    %c0_141 = arith.constant 0 : index
    %c0_142 = arith.constant 0 : index
    %714 = vector.load %arg9[%c0_141, %c0_142] : memref<2x64xf32, #tpu.memory_space<vmem>>, vector<2x32xf32>
    tpu.vector_store %arg9[%c0_141, %c0_142], %690 {strides = array<i32>} : memref<2x64xf32, #tpu.memory_space<vmem>>, vector<2x32xf32>,
    %c0_143 = arith.constant 0 : index
    %c32 = arith.constant 32 : index
    %715 = vector.load %arg9[%c0_143, %c32] : memref<2x64xf32, #tpu.memory_space<vmem>>, vector<2x32xf32>
    tpu.vector_store %arg9[%c0_143, %c32], %696 {strides = array<i32>} : memref<2x64xf32, #tpu.memory_space<vmem>>, vector<2x32xf32>,
    %c0_144 = arith.constant 0 : index
    %c0_145 = arith.constant 0 : index
    %716 = vector.load %arg10[%c0_144, %c0_145] : memref<2x64xf32, #tpu.memory_space<vmem>>, vector<2x32xf32>
    tpu.vector_store %arg10[%c0_144, %c0_145], %693 {strides = array<i32>} : memref<2x64xf32, #tpu.memory_space<vmem>>, vector<2x32xf32>,
    %c0_146 = arith.constant 0 : index
    %c32_147 = arith.constant 32 : index
    %717 = vector.load %arg10[%c0_146, %c32_147] : memref<2x64xf32, #tpu.memory_space<vmem>>, vector<2x32xf32>
    tpu.vector_store %arg10[%c0_146, %c32_147], %699 {strides = array<i32>} : memref<2x64xf32, #tpu.memory_space<vmem>>, vector<2x32xf32>,
    return
  }
  func.func @transform_0(%arg0: i32) -> (i32, i32) {
    %c0_i32 = arith.constant 0 : i32
    %c0_i32_0 = arith.constant 0 : i32
    return %arg0, %c0_i32 : i32, i32
  }
  func.func @transform_1(%arg0: i32) -> (i32, i32) {
    %c0_i32 = arith.constant 0 : i32
    %c0_i32_0 = arith.constant 0 : i32
    return %arg0, %c0_i32 : i32, i32
  }
  func.func @transform_2(%arg0: i32) -> (i32, i32) {
    %c0_i32 = arith.constant 0 : i32
    %c0_i32_0 = arith.constant 0 : i32
    %c0_i32_1 = arith.constant 0 : i32
    return %c0_i32, %c0_i32_0 : i32, i32
  }
  func.func @transform_3(%arg0: i32) -> (i32, i32) {
    %c0_i32 = arith.constant 0 : i32
    %c0_i32_0 = arith.constant 0 : i32
    %c0_i32_1 = arith.constant 0 : i32
    return %c0_i32, %c0_i32_0 : i32, i32
  }
  func.func @transform_4(%arg0: i32) -> (i32, i32) {
    %c0_i32 = arith.constant 0 : i32
    %c0_i32_0 = arith.constant 0 : i32
    %c0_i32_1 = arith.constant 0 : i32
    return %c0_i32, %c0_i32_0 : i32, i32
  }
  func.func @transform_5(%arg0: i32) -> (i32, i32) {
    %c0_i32 = arith.constant 0 : i32
    %c0_i32_0 = arith.constant 0 : i32
    %c0_i32_1 = arith.constant 0 : i32
    return %c0_i32, %c0_i32_0 : i32, i32
  }
  func.func @transform_6(%arg0: i32) -> (i32, i32, i32) {
    %c0_i32 = arith.constant 0 : i32
    %c0_i32_0 = arith.constant 0 : i32
    %c0_i32_1 = arith.constant 0 : i32
    return %arg0, %c0_i32, %c0_i32_0 : i32, i32, i32
  }
  func.func @transform_7(%arg0: i32) -> (i32, i32, i32) {
    %c0_i32 = arith.constant 0 : i32
    %c0_i32_0 = arith.constant 0 : i32
    %c0_i32_1 = arith.constant 0 : i32
    return %arg0, %c0_i32, %c0_i32_0 : i32, i32, i32
  }
  func.func @transform_8(%arg0: i32) -> (i32, i32) {
    %c0_i32 = arith.constant 0 : i32
    %c0_i32_0 = arith.constant 0 : i32
    return %arg0, %c0_i32 : i32, i32
  }
  func.func @transform_9(%arg0: i32) -> (i32, i32) {
    %c0_i32 = arith.constant 0 : i32
    %c0_i32_0 = arith.constant 0 : i32
    return %arg0, %c0_i32 : i32, i32
  }
}

</mosaic_0001>

<bundles_post_ra>
// kernel: tpu_custom_call.1
= control target key start
LH: loop header
LB: loop body
LE: loop exit
PB: predicated region body
PF: predicated region fallthrough
CT: control target
= control target key end

     0   :  { %15 = vsyncpa [#allocation3], 0  ;;  %s3509_s0 = inlined_call_operand.vmem [shape: s32[2,1], index: 0, kind: input, shape index: {}]   ;;  %s3510_s1 = inlined_call_operand.hbm [shape: bf16[16,32], index: 1, kind: input, shape index: {}]   ;;  %s3511_s2 = inlined_call_operand.hbm [shape: bf16[32,256], index: 2, kind: input, shape index: {}]   ;;  %s3512_s3 = inlined_call_operand.vmem [shape: f32[1,256], index: 3, kind: input, shape index: {}]   ;;  %s3513_s4 = inlined_call_operand.hbm [shape: bf16[32,128], index: 4, kind: input, shape index: {}]   ;;  %s3514_s5 = inlined_call_operand.hbm [shape: bf16[32,128], index: 5, kind: input, shape index: {}]   ;;  %s3515_s6 = inlined_call_operand.hbm [shape: f32[2,8,32], index: 6, kind: output, shape index: {0}]   ;;  %s3516_s7 = inlined_call_operand.hbm [shape: f32[2,8,32], index: 7, kind: output, shape index: {1}]   ;;  %s3517_s8 = inlined_call_operand.hbm [shape: f32[2,64], index: 8, kind: output, shape index: {2}]   ;;  %s3518_s9 = inlined_call_operand.hbm [shape: f32[2,64], index: 9, kind: output, shape index: {3}]  }
   0x1   :  { %16 = vsyncpa [#allocation6], 0 }
   0x2   :  { %17 = vsyncpa [#allocation9], 0 }
   0x3   :  { %18 = vsyncpa [#allocation4], 0 }
   0x4   :  { %19 = vsyncpa [#allocation12], 0 }
   0x5   :  { %20 = vsyncpa [#allocation15], 0  ;;  %s2764_s30 = smov [#allocation5]  }
   0x6   :  { %s40_s10 = sshll.u32 %s2764_s30, 4  ;;  %s41_s10 = int_to_ptr.vmem [resolvable:$true] %s40_s10 }
   0x7   :  { %s2600_s11 = scalar_lea.vmem %s41_s10, 512  ;;  %p2605_p1 = scmp.lt.s32.totalorder %s41_s10, %s41_s10 }
   0x8   :  { %p2601_p0 = scmp.ne.s32.totalorder %s41_s10, %s2600_s11  ;;  %p2606_p2 = scmp.lt.s32.totalorder %s2600_s11, %s2600_s11 }
   0xa   :  { %p2607_p3 = por %p2606_p2, %p2605_p1 }
   0xc   :  { %p2608_p4 = pnand %p2607_p3, %p2601_p0 }
   0xe   :  { %2611 = shalt.err (!%p2608_p4)
}
   0xf   :  { %s2765_s12 = smov 128   ;;  %s2766_s13 = smov 8  }
  0x10   :  { %46 = dma.hbm_to_vmem [thread:$0]  %s3511_s2, 512, %s41_s10, [#allocation6], %s2765_s12, %s2765_s12, %s2766_s13  }
  0x11   :  { %s2767_s16 = smov [#allocation2]  }
  0x12   :  { %s28_s17 = sshll.u32 %s2767_s16, 4  ;;  %s29_s17 = int_to_ptr.vmem [resolvable:$true] %s28_s17 }
  0x13   :  { %s2620_s18 = scalar_lea.vmem %s29_s17, 128  ;;  %p2625_p6 = scmp.lt.s32.totalorder %s29_s17, %s29_s17 }
  0x14   :  { %p2621_p5 = scmp.ne.s32.totalorder %s29_s17, %s2620_s18  ;;  %p2626_p7 = scmp.lt.s32.totalorder %s2620_s18, %s2620_s18 }
  0x16   :  { %p2627_p8 = por %p2626_p7, %p2625_p6 }
  0x18   :  { %p2628_p9 = pnand %p2627_p8, %p2621_p5 }
  0x1a   :  { %2631 = shalt.err (!%p2628_p9)
}
  0x1b   :  { %s2768_s19 = smov 64   ;;  %s2769_s20 = smov 4  }
  0x1c   :  { %34 = dma.hbm_to_vmem [thread:$0]  %s3510_s1, 128, %s29_s17, [#allocation3], %s2768_s19, %s2768_s19, %s2769_s20  }
  0x1d   :  { %s2770_s23 = smov [#allocation7]   ;;  %s2771_s24 = smov [#allocation8]  }
  0x1e   :  { %s54_s2 = sshll.u32 %s2770_s23, 4  ;;  %s66_s25 = sshll.u32 %s2771_s24, 4  ;;  %s55_s2 = int_to_ptr.vmem [resolvable:$true] %s54_s2  ;;  %s67_s25 = int_to_ptr.vmem [resolvable:$true] %s66_s25 }
  0x1f   :  { %s2640_s26 = scalar_lea.vmem %s55_s2, 256  ;;  %p2645_p11 = scmp.lt.s32.totalorder %s55_s2, %s55_s2 }
  0x20   :  { %p2641_p10 = scmp.ne.s32.totalorder %s55_s2, %s2640_s26  ;;  %p2646_p12 = scmp.lt.s32.totalorder %s2640_s26, %s2640_s26 }
  0x22   :  { %p2647_p13 = por %p2646_p12, %p2645_p11 }
  0x24   :  { %p2648_p0 = pnand %p2647_p13, %p2641_p10 }
  0x26   :  { %2651 = shalt.err (!%p2648_p0)
}
  0x27   :  { %60 = dma.hbm_to_vmem [thread:$0]  %s3513_s4, 256, %s55_s2, [#allocation6], %s2768_s19, %s2768_s19, %s2769_s20  }
  0x28   :  { %s2660_s1 = scalar_lea.vmem %s67_s25, 256  ;;  %p2665_p2 = scmp.lt.s32.totalorder %s67_s25, %s67_s25 }
  0x29   :  { %p2661_p1 = scmp.ne.s32.totalorder %s67_s25, %s2660_s1  ;;  %p2666_p3 = scmp.lt.s32.totalorder %s2660_s1, %s2660_s1 }
  0x2b   :  { %p2667_p4 = por %p2666_p3, %p2665_p2 }
  0x2d   :  { %p2668_p5 = pnand %p2667_p4, %p2661_p1 }
  0x2f   :  { %2671 = shalt.err (!%p2668_p5)
}
  0x30   :  { %72 = dma.hbm_to_vmem [thread:$0]  %s3514_s5, 256, %s67_s25, [#allocation9], %s2768_s19, %s2768_s19, %s2769_s20  }
  0x31   :  { %2752 = dma.done.wait [#allocation3], 128  }
  0x32   :  { %2753 = vsyncadd [#allocation3], 4294967168 }
  0x33   :  { %2754 = dma.done.wait [#allocation6], 768  }
  0x34   :  { %2755 = vsyncadd [#allocation6], 4294966528 }
  0x35   :  { %2756 = dma.done.wait [#allocation9], 256  }
  0x36   :  { %2757 = vsyncadd [#allocation9], 4294967040  ;;  %v2772_v0 = vmov 0.0   ;;  %v2773_v1 = vmov 0   ;;  %vm2774_vm0 = vmmov 0   ;;  %v2859_v5 = vld [vmem:[#allocation7 + $0x8] sm:$0xff]   ;;  %v95_v11 = vlaneseq }
  0x37   :  { %2301 = vmatprep.subr.bf16.mxu1 %v2772_v0  ;;  %166 = vmatprep.mubr.bf16.mxu0 %v2773_v1  ;;  %v2449_v2 = vld [vmem:[#allocation5 + $0x14] ss:$8 sps:$4 sm:$0xff]   ;;  %v2451_v3 = vld [vmem:[#allocation5 + $0x10] ss:$8 sps:$4 sm:$0xff]   ;;  %v2452_v4 = vld [vmem:[#allocation5 + $0x4] ss:$8 sps:$4 sm:$0xff]  }
  0x38   :  { %2305 = vmatprep.mubr.msk.bf16.mxu1 %vm2774_vm0, %v2772_v0  ;;  %2447 = vset.pattern.permute.xlu0 %v2773_v1  ;;  %v2455_v6 = vld [vmem:[#allocation5] ss:$8 sps:$4 sm:$0xff]   ;;  %v2456_v8 = vld [vmem:[#allocation2] sm:$0xff]   ;;  %vm130_vm1 = vcmask 261120   ;;  %v2872_v10 = vld [vmem:[#allocation8] sm:$0xff]   ;;  %v2893_v12 = vshrl.u32 %v95_v11, 7 }
  0x39   :  { %2448 = vset.pattern.permute.xlu1 %v2773_v1  ;;  %146 = vmatprep.subr.bf16.mxu0 %v2449_v2  ;;  %v2862_v7 = vld [vmem:[#allocation7] sm:$0xff]   ;;  %v2865_v9 = vld [vmem:[#allocation8 + $0x8] sm:$0xff]   ;;  %s2776_s11 = smov 96   ;;  %vm408_vm6 = vcmask 253952   ;;  %s2778_s14 = smov [#allocation14]  }
  0x3a   :  { %147 = vmatpush1.bf16.msra.mxu0 %v2451_v3  ;;  %2302 = vmatpush3.bf16.msra.mxu1 %v2859_v5  ;;  %v101_v13 = vsub.s32 1, %v2893_v12  ;;  %v93_v14 = vld [vmem:[%s3512_s3] sm:$0x3]  ;;  %v2900_v15 = vsub.s32 0, %v2893_v12  ;;  %s2191_s15 = sshll.u32 %s2778_s14, 4  ;;  %s2192_s15 = int_to_ptr.vmem [resolvable:$true] %s2191_s15 }
  0x3b   :  { %148 = vmatprep.subr.bf16.mxu0 %v2452_v4  ;;  %2303 = vmatprep.subr.bf16.mxu1 %v2772_v0  ;;  %v2916_v38 = vld [vmem:[%s3509_s0] sm:$0x3]  ;;  %s2775_s0 = smov 32   ;;  %s2672_s16 = scalar_lea.vmem %s2192_s15, 32 }
  0x3c   :  { %v102_v16 = vrot.slane %v93_v14, %v101_v13  ;;  %v98_v20 = vrot.slane %v93_v14, %v2900_v15  ;;  %vm345_vm2 = vcmp.gt.s32.totalorder %v2916_v38, 0  ;;  %vm346_vm3 = vcmp.gt.s32.totalorder %v2916_v38, 7  ;;  %p2673_p6 = scmp.ne.s32.totalorder %s2192_s15, %s2672_s16  ;;  %p2677_p7 = scmp.lt.s32.totalorder %s2192_s15, %s2192_s15 }
  0x3d   :  { %v347_v40 = vsel %vm345_vm2, 1, %v2773_v1  ;;  %v354_v47 = vsel %vm346_vm3, 1, %v2773_v1  ;;  %v2777_v14 = vmov 1966171168   ;;  %vm594_vm7 = vcmp.gt.s32.totalorder %v2916_v38, 6  ;;  %p2678_p8 = scmp.lt.s32.totalorder %s2672_s16, %s2672_s16 }
  0x3e   :  { %149 = vmatpush1.bf16.msra.mxu0 %v2455_v6  ;;  %2304 = vmatpush3.bf16.msra.mxu1 %v2862_v7  ;;  %vm593_vm8 = vcmp.gt.s32.totalorder %v2916_v38, 1  ;;  %vm845_vm11 = vcmp.gt.s32.totalorder %v2916_v38, 2  ;;  %vm846_vm12 = vcmp.gt.s32.totalorder %v2916_v38, 5  ;;  %vm1088_vm15 = vcmp.gt.s32.totalorder %v2916_v38, 4 }
  0x3f   :  { %2309 = vmatprep.subr.bf16.mxu0 %v2772_v0  ;;  %2317 = vmatprep.subr.bf16.mxu1 %v2772_v0  ;;  %vm1087_vm2 = vcmp.gt.s32.totalorder %v2916_v38, 3  ;;  %p2679_p9 = por %p2678_p8, %p2677_p7 }
  0x41   :  { %2218 = vmatmul.mubr.msk.bf16.vlgmr.msra.gmra.mxu0 %vm130_vm1, %v2456_v8  ;;  %2306 = vmatmul.mubr.bf16.vlgmr.msra.gmra.mxu1 %v2773_v1  ;;  %p2680_p10 = pnand %p2679_p9, %p2673_p6 }
  0x42   :  { %2310 = vmatpush3.bf16.msra.mxu0 %v2865_v9  ;;  %2313 = vmatprep.mubr.msk.bf16.mxu0 %vm2774_vm0, %v2772_v0 }
  0x43   :  { %2311 = vmatprep.subr.bf16.mxu0 %v2772_v0  ;;  %2318 = vmatpush3.bf16.msra.mxu1 %v2859_v5 }
  0x44   :  { %2321 = vmatprep.mubr.msk.bf16.mxu1 %vm2774_vm0, %v2772_v0  ;;  %2319 = vmatprep.subr.bf16.mxu1 %v2772_v0 }
  0x46   :  { %2312 = vmatpush3.bf16.msra.mxu0 %v2872_v10 }
  0x47   :  { %2325 = vmatprep.subr.bf16.mxu0 %v2772_v0  ;;  %2320 = vmatpush3.bf16.msra.mxu1 %v2862_v7 }
  0x48   :  { %2333 = vmatprep.subr.bf16.mxu1 %v2772_v0 }
  0x49   :  { %2314 = vmatmul.mubr.bf16.vlgmr.msra.gmra.mxu0 %v2773_v1 }
  0x4a   :  { %2326 = vmatpush3.bf16.msra.mxu0 %v2865_v9  ;;  %2329 = vmatprep.mubr.msk.bf16.mxu0 %vm2774_vm0, %v2772_v0 }
  0x4b   :  { %2327 = vmatprep.subr.bf16.mxu0 %v2772_v0 }
  0x4e   :  { %2328 = vmatpush3.bf16.msra.mxu0 %v2872_v10 }
  0x4f   :  { %2341 = vmatprep.subr.bf16.mxu0 %v2772_v0 }
 0x101   :  { %v168_v17 = vpop.f32.mrf.mxu0  ;;  %v234_v19 = vpop.f32.mrf.mxu1 }
 0x102   :  { %v2907_v29 = vadd.f32 %v168_v17, %v98_v20 }
 0x103   :  { %v170_v18 = vpop.f32.mrf.mxu0  ;;  %v2307_v23 = vpop.f32.mrf.mxu1 }
 0x104   :  { %v2903_v21 = vadd.f32 %v170_v18, %v102_v16  ;;  %v292_v35 = vadd.f32 %v234_v19, %v2907_v29 }
 0x105   :  { %v172_v22 = vpop.f32.mrf.mxu0  ;;  %v237_v26 = vpop.f32.mrf.mxu1 }
 0x106   :  { %v2905_v24 = vadd.f32 %v172_v22, %v98_v20  ;;  %v2223_v42 = vmul.f32 -1.442695, %v292_v35 }
 0x107   :  { %v174_v25 = vpop.f32.mrf.mxu0  ;;  %v2308_v28 = vpop.f32.mrf.mxu1 }
 0x108   :  { %v2909_v30 = vadd.f32 %v174_v25, %v102_v16  ;;  %v373_v16 = vunpack.c.l.s4 %v2777_v14 }
 0x109   :  { %v286_v27 = vpop.f32.mrf.mxu0 }
 0x10a   :  { %v294_v31 = vrot.slane %v286_v27, 2  ;;  %v374_v17 = vunpack.c.0.s8 %v373_v16 }
 0x10b   :  { %v2315_v32 = vpop.f32.mrf.mxu0 }
 0x10c   :  { %v296_v33 = vadd.f32 %v294_v31, %v2909_v30  ;;  %v2946_v19 = vsub.s32 %v374_v17, %v2893_v12 }
 0x10d   :  { %v289_v34 = vpop.f32.mrf.mxu0 }
 0x10e   :  { %2460 = vtanh.f32 %v296_v33  ;;  %v2224_v41 = vmul.f32 -1.442695, %v296_v33 }
 0x10f   :  { %v2316_v36 = vpop.f32.mrf.mxu0  ;;  %2462 = vtanh.f32 %v292_v35 }
 0x110   :  { %2464 = vpow2.f32 %v2224_v41 }
 0x111   :  { %2466 = vpow2.f32 %v2223_v42 }
 0x11b   :  { %v2461_v37 = vpop.eup %2460 }
 0x11c   :  { %330 = vrot.lane.b32.xlu0 %v2461_v37, %s2768_s19  ;;  %v2463_v39 = vpop.eup %2462 }
 0x11d   :  { %v2465_v43 = vpop.eup %2464 }
 0x11e   :  { %v324_v44 = vadd.f32 1.0, %v2465_v43  ;;  %v2467_v45 = vpop.eup %2466 }
 0x11f   :  { %v300_v46 = vadd.f32 1.0, %v2467_v45 }
 0x120   :  { %306 = vrot.lane.b32.xlu0 %v2463_v39, %s2768_s19  ;;  %2468 = vrcp.f32 %v324_v44 }
 0x121   :  { %2470 = vrcp.f32 %v300_v46 }
 0x124   :  { %349 = vperm.xlu0 %2447, %v347_v40  }
 0x128   :  { %356 = vperm.xlu0 %2447, %v354_v47  }
 0x12d   :  { %v2469_v48 = vpop.eup %2468 }
 0x12e   :  { %v2471_v51 = vpop.eup %2470  ;;  %v328_v54 = vmul.f32 0.0, %v2469_v48 }
 0x12f   :  { %v304_v57 = vmul.f32 0.0, %v2471_v51 }
 0x18e   :  { %v331_v49 = vpop.permute.xlu0 %330 }
 0x18f   :  { %v333_v50 = vmul.f32 %v2469_v48, %v331_v49 }
 0x191   :  { %335 = vrot.lane.b32.xlu1 %v333_v50, %s2775_s0 }
 0x192   :  { %v307_v52 = vpop.permute.xlu0 %306 }
 0x193   :  { %v309_v53 = vmul.f32 %v2471_v51, %v307_v52 }
 0x195   :  { %311 = vrot.lane.b32.xlu1 %v309_v53, %s2775_s0 }
 0x19f   :  { %v2931_v2 = vpop.permute.xlu0 %349 }
 0x1a0   :  { %vm351_vm4 = vcmp.eq.s32.totalorder %v2931_v2, 1 }
 0x1a3   :  { %v2943_v18 = vpop.permute.xlu0 %356 }
 0x1a4   :  { %vm358_vm5 = vcmp.eq.s32.totalorder %v2943_v18, 1 }
 0x203   :  { %v336_v55 = vpop.permute.xlu1 %335 }
 0x204   :  { %v338_v56 = vadd.f32 %v336_v55, %v328_v54 }
 0x206   :  { %2472 = vtanh.f32 %v338_v56  ;;  %v366_v8 = vrot.slane %v338_v56, 6 }
 0x207   :  { %v312_v58 = vpop.permute.xlu1 %311 }
 0x208   :  { %v2926_v59 = vadd.f32 %v312_v58, %v304_v57 }
 0x20a   :  { %2474 = vtanh.f32 %v2926_v59 }
 0x213   :  { %v2473_v60 = vpop.eup %2472 }
 0x214   :  { %341 = vrot.lane.b32.xlu1 %v2473_v60, %s2768_s19 }
 0x217   :  { %v2475_v61 = vpop.eup %2474 }
 0x218   :  { %317 = vrot.lane.b32.xlu1 %v2475_v61, %s2768_s19 }
 0x286   :  { %v342_v62 = vpop.permute.xlu1 %341 }
 0x287   :  { %v344_v63 = vmul.f32 %v2469_v48, %v342_v62 }
 0x289   :  { %v360_v3 = vrot.slane %v344_v63, 6  ;;  %v353_v63 = vsel %vm351_vm4, %v2926_v59, 0.0  ;;  %v595_v59 = vsel %vm593_vm8, 1, %v2773_v1 }
 0x28a   :  { %v318_v4 = vpop.permute.xlu1 %317 }
 0x28b   :  { %v320_v6 = vmul.f32 %v2471_v51, %v318_v4  ;;  %361 = vrot.lane.b32.xlu1 %v360_v3, %s2775_s0 }
 0x28d   :  { %v2937_v11 = vsel %vm351_vm4, %v320_v6, 0.0  ;;  %v545_v6 = vrot.slane %v353_v63, 6 }
 0x28e   :  { %v438_v13 = vpack.c.bf16 %v2937_v11, %v2937_v11 }
 0x28f   :  { %367 = vrot.lane.b32.xlu1 %v366_v8, %s2776_s11 }
 0x290   :  { %440 = vrot.lane.b32.xlu0 %v438_v13, %s2775_s0 }
 0x2fd   :  { %v362_v20 = vpop.permute.xlu1 %361 }
 0x2fe   :  { %v2951_v22 = vsel %vm358_vm5, %v362_v20, 0.0  ;;  %v618_v20 = vsel %vm594_vm7, 1, %v2773_v1 }
 0x2ff   :  { %v418_v23 = vrot.slane %v2951_v22, %v2946_v19  ;;  %v485_v25 = vpack.c.bf16 %v2951_v22, %v2951_v22 }
 0x301   :  { %v419_v26 = vcombine.high %v418_v23, %v418_v23  ;;  %v426_v27 = vrot.slane %v418_v23, %v2946_v19  ;;  %2330 = vmatmul.mubr.msk.bf16.vlgmr.msra.gmra.mxu0 %vm130_vm1, %v485_v25  ;;  %v368_v45 = vpop.permute.xlu1 %367 }
 0x302   :  { %v441_v12 = vpop.permute.xlu0 %440  ;;  %2342 = vmatpush3.bf16.msra.mxu0 %v2865_v9  ;;  %2345 = vmatprep.mubr.msk.bf16.mxu0 %vm2774_vm0, %v2772_v0  ;;  %v2980_v47 = vsel %vm358_vm5, %v368_v45, 0.0 }
 0x303   :  { %v433_v28 = vrot.slane %v419_v26, %v2946_v19  ;;  %436 = vst.msk [vmem:[#allocation11 + $0x7] sm:$0x1] %vm408_vm6, %v426_v27  ;;  %2322 = vmatmul.mubr.msk.bf16.vlgmr.msra.gmra.mxu1 %vm130_vm1, %v441_v12  ;;  %2343 = vmatprep.subr.bf16.mxu0 %v2772_v0  ;;  %v572_v48 = vrot.slane %v2980_v47, 4 }
 0x304   :  { %2334 = vmatpush3.bf16.msra.mxu1 %v2859_v5  ;;  %2337 = vmatprep.mubr.msk.bf16.mxu1 %vm2774_vm0, %v2772_v0 }
 0x305   :  { %437 = vst.msk [vmem:[#allocation11 + $0xf] sm:$0x1] %vm408_vm6, %v433_v28  ;;  %2335 = vmatprep.subr.bf16.mxu1 %v2772_v0 }
 0x306   :  { %2344 = vmatpush3.bf16.msra.mxu0 %v2872_v10 }
 0x307   :  { %2357 = vmatprep.subr.bf16.mxu0 %v2772_v0 }
 0x308   :  { %2336 = vmatpush3.bf16.msra.mxu1 %v2862_v7 }
 0x309   :  { %2349 = vmatprep.subr.bf16.mxu1 %v2772_v0 }
 0x3c1   :  { %v523_v31 = vpop.f32.mrf.mxu0 }
 0x3c2   :  { %v534_v32 = vrot.slane %v523_v31, 4 }
 0x3c3   :  { %v479_v33 = vpop.f32.mrf.mxu1  ;;  %v2331_v34 = vpop.f32.mrf.mxu0 }
 0x3c4   :  { %v536_v35 = vadd.f32 %v534_v32, %v2909_v30  ;;  %v530_v36 = vrot.slane %v479_v33, 6 }
 0x3c5   :  { %v2323_v37 = vpop.f32.mrf.mxu1  ;;  %v526_v39 = vpop.f32.mrf.mxu0 }
 0x3c6   :  { %2476 = vtanh.f32 %v536_v35  ;;  %v532_v40 = vadd.f32 %v530_v36, %v2907_v29  ;;  %v2228_v49 = vmul.f32 -1.442695, %v536_v35 }
 0x3c7   :  { %v482_v41 = vpop.f32.mrf.mxu1  ;;  %v2332_v42 = vpop.f32.mrf.mxu0 }
 0x3c8   :  { %2478 = vtanh.f32 %v532_v40  ;;  %v2227_v50 = vmul.f32 -1.442695, %v532_v40 }
 0x3c9   :  { %v2324_v43 = vpop.f32.mrf.mxu1  ;;  %2480 = vpow2.f32 %v2228_v49 }
 0x3ca   :  { %2482 = vpow2.f32 %v2227_v50 }
 0x3d3   :  { %v2477_v44 = vpop.eup %2476 }
 0x3d4   :  { %578 = vrot.lane.b32.xlu1 %v2477_v44, %s2768_s19 }
 0x3d5   :  { %v2479_v46 = vpop.eup %2478 }
 0x3d6   :  { %549 = vrot.lane.b32.xlu0 %v2479_v46, %s2768_s19  ;;  %v2481_v51 = vpop.eup %2480 }
 0x3d7   :  { %v2483_v52 = vpop.eup %2482  ;;  %v567_v53 = vadd.f32 1.0, %v2481_v51 }
 0x3d8   :  { %v540_v54 = vadd.f32 1.0, %v2483_v52 }
 0x3d9   :  { %2484 = vrcp.f32 %v567_v53 }
 0x3da   :  { %573 = vrot.lane.b32.xlu0 %v572_v48, %s2775_s0  ;;  %2486 = vrcp.f32 %v540_v54 }
 0x3e6   :  { %v2485_v55 = vpop.eup %2484 }
 0x3e7   :  { %v2487_v58 = vpop.eup %2486 }
 0x3e8   :  { %v547_v13 = vmul.f32 %v2487_v58, %v545_v6 }
 0x446   :  { %v579_v56 = vpop.permute.xlu1 %578 }
 0x447   :  { %v581_v57 = vmul.f32 %v2485_v55, %v579_v56 }
 0x448   :  { %v550_v60 = vpop.permute.xlu0 %549 }
 0x449   :  { %583 = vrot.lane.b32.xlu0 %v581_v57, %s2775_s0  ;;  %v552_v61 = vmul.f32 %v2487_v58, %v550_v60 }
 0x44b   :  { %554 = vrot.lane.b32.xlu1 %v552_v61, %s2775_s0 }
 0x44c   :  { %v574_v62 = vpop.permute.xlu0 %573 }
 0x44d   :  { %v576_v3 = vmul.f32 %v2485_v55, %v574_v62 }
 0x4bb   :  { %v584_v4 = vpop.permute.xlu0 %583 }
 0x4bc   :  { %v586_v8 = vadd.f32 %v584_v4, %v576_v3 }
 0x4bd   :  { %v555_v14 = vpop.permute.xlu1 %554 }
 0x4be   :  { %2488 = vtanh.f32 %v586_v8  ;;  %v557_v16 = vadd.f32 %v555_v14, %v547_v13  ;;  %v630_v26 = vrot.slane %v586_v8, 4 }
 0x4c0   :  { %2490 = vtanh.f32 %v557_v16  ;;  %v610_v25 = vrot.slane %v557_v16, 2 }
 0x4cb   :  { %v2489_v17 = vpop.eup %2488 }
 0x4cc   :  { %589 = vrot.lane.b32.xlu0 %v2489_v17, %s2768_s19 }
 0x4cd   :  { %v2491_v23 = vpop.eup %2490 }
 0x4ce   :  { %560 = vrot.lane.b32.xlu1 %v2491_v23, %s2768_s19 }
 0x4d0   :  { %620 = vperm.xlu0 %2447, %v618_v20  }
 0x4d2   :  { %597 = vperm.xlu1 %2448, %v595_v59  }
 0x4d4   :  { %605 = vrot.lane.b32.xlu0 %v2937_v11, %s2775_s0 }
 0x4d8   :  { %611 = vrot.lane.b32.xlu0 %v610_v25, %s2776_s11 }
 0x4dc   :  { %631 = vrot.lane.b32.xlu0 %v630_v26, %s2776_s11 }
 0x53e   :  { %v590_v27 = vpop.permute.xlu0 %589 }
 0x53f   :  { %v592_v31 = vmul.f32 %v2485_v55, %v590_v27 }
 0x540   :  { %v561_v12 = vpop.permute.xlu1 %560 }
 0x541   :  { %v563_v28 = vmul.f32 %v2487_v58, %v561_v12  ;;  %v624_v33 = vrot.slane %v592_v31, 4 }
 0x543   :  { %v601_v32 = vrot.slane %v563_v28, 2 }
 0x545   :  { %602 = vrot.lane.b32.xlu1 %v601_v32, %s2775_s0 }
 0x549   :  { %625 = vrot.lane.b32.xlu1 %v624_v33, %s2775_s0 }
 0x54b   :  { %v3003_v34 = vpop.permute.xlu0 %620 }
 0x54c   :  { %vm622_vm10 = vcmp.eq.s32.totalorder %v3003_v34, 1 }
 0x54d   :  { %614 = vrot.lane.b32.xlu1 %v353_v63, %s2776_s11  ;;  %v3005_v35 = vpop.permute.xlu1 %597 }
 0x54e   :  { %vm599_vm9 = vcmp.eq.s32.totalorder %v3005_v35, 1 }
 0x54f   :  { %v606_v36 = vpop.permute.xlu0 %605 }
 0x553   :  { %v612_v8 = vpop.permute.xlu0 %611 }
 0x557   :  { %v632_v17 = vpop.permute.xlu0 %631 }
 0x558   :  { %v3061_v59 = vsel %vm622_vm10, %v632_v17, %v2980_v47 }
 0x559   :  { %v824_v25 = vrot.slane %v3061_v59, 6 }
 0x5b7   :  { %v603_v37 = vpop.permute.xlu1 %602 }
 0x5b8   :  { %v3010_v39 = vsel %vm599_vm9, %v603_v37, %v606_v36  ;;  %v635_v40 = vsel %vm599_vm9, %v603_v37, 0.0 }
 0x5b9   :  { %v643_v41 = vrot.slane %v635_v40, %v2946_v19  ;;  %v691_v42 = vpack.c.bf16 %v3010_v39, %v3010_v39 }
 0x5bb   :  { %v644_v43 = vcombine.high %v643_v41, %v643_v41  ;;  %v651_v44 = vrot.slane %v643_v41, %v2946_v19  ;;  %2338 = vmatmul.mubr.msk.bf16.vlgmr.msra.gmra.mxu1 %vm130_vm1, %v691_v42  ;;  %v626_v45 = vpop.permute.xlu1 %625 }
 0x5bc   :  { %v3023_v46 = vsel %vm622_vm10, %v626_v45, %v2951_v22  ;;  %v663_v48 = vsel %vm622_vm10, %v626_v45, 0.0  ;;  %2350 = vmatpush3.bf16.msra.mxu1 %v2859_v5  ;;  %2353 = vmatprep.mubr.msk.bf16.mxu1 %vm2774_vm0, %v2772_v0 }
 0x5bd   :  { %v658_v49 = vrot.slane %v644_v43, %v2946_v19  ;;  %661 = vst.msk [vmem:[#allocation10 + $0x1] sm:$0x1] %vm408_vm6, %v651_v44  ;;  %v671_v50 = vrot.slane %v663_v48, %v2946_v19  ;;  %v735_v51 = vpack.c.bf16 %v3023_v46, %v3023_v46  ;;  %2351 = vmatprep.subr.bf16.mxu1 %v2772_v0 }
 0x5bf   :  { %662 = vst.msk [vmem:[#allocation10 + $0x9] sm:$0x1] %vm408_vm6, %v658_v49  ;;  %v672_v22 = vcombine.high %v671_v50, %v671_v50  ;;  %v679_v52 = vrot.slane %v671_v50, %v2946_v19  ;;  %2346 = vmatmul.mubr.msk.bf16.vlgmr.msra.gmra.mxu0 %vm130_vm1, %v735_v51  ;;  %v615_v13 = vpop.permute.xlu1 %614 }
 0x5c0   :  { %2352 = vmatpush3.bf16.msra.mxu1 %v2862_v7  ;;  %2358 = vmatpush3.bf16.msra.mxu0 %v2865_v9  ;;  %v3054_v16 = vsel %vm599_vm9, %v612_v8, %v615_v13 }
 0x5c1   :  { %v686_v53 = vrot.slane %v672_v22, %v2946_v19  ;;  %689 = vst.msk [vmem:[#allocation11 + $0x6] sm:$0x1] %vm408_vm6, %v679_v52  ;;  %2359 = vmatprep.subr.bf16.mxu0 %v2772_v0  ;;  %2361 = vmatprep.mubr.msk.bf16.mxu0 %vm2774_vm0, %v2772_v0  ;;  %v795_v20 = vrot.slane %v3054_v16, 4  ;;  %v847_v52 = vsel %vm845_vm11, 1, %v2773_v1 }
 0x5c2   :  { %2365 = vmatprep.subr.bf16.mxu1 %v2772_v0 }
 0x5c3   :  { %690 = vst.msk [vmem:[#allocation11 + $0xe] sm:$0x1] %vm408_vm6, %v686_v53 }
 0x5c4   :  { %2360 = vmatpush3.bf16.msra.mxu0 %v2872_v10 }
 0x5c5   :  { %2373 = vmatprep.subr.bf16.mxu0 %v2772_v0 }
 0x67b   :  { %v729_v54 = vpop.f32.mrf.mxu1 }
 0x67c   :  { %v780_v55 = vrot.slane %v729_v54, 4  ;;  %v864_v54 = vsel %vm846_vm12, 1, %v2773_v1 }
 0x67d   :  { %v2339_v56 = vpop.f32.mrf.mxu1 }
 0x67e   :  { %v782_v57 = vadd.f32 %v780_v55, %v2907_v29 }
 0x67f   :  { %v732_v58 = vpop.f32.mrf.mxu1  ;;  %v773_v60 = vpop.f32.mrf.mxu0 }
 0x680   :  { %2492 = vtanh.f32 %v782_v57  ;;  %v784_v61 = vrot.slane %v773_v60, 6  ;;  %v2231_v26 = vmul.f32 -1.442695, %v782_v57 }
 0x681   :  { %v2340_v62 = vpop.f32.mrf.mxu1  ;;  %v2347_v63 = vpop.f32.mrf.mxu0 }
 0x682   :  { %v786_v3 = vadd.f32 %v784_v61, %v2909_v30 }
 0x683   :  { %v776_v4 = vpop.f32.mrf.mxu0 }
 0x684   :  { %2494 = vtanh.f32 %v786_v3  ;;  %v2232_v27 = vmul.f32 -1.442695, %v786_v3 }
 0x685   :  { %v2348_v6 = vpop.f32.mrf.mxu0  ;;  %2496 = vpow2.f32 %v2231_v26 }
 0x686   :  { %2498 = vpow2.f32 %v2232_v27 }
 0x68d   :  { %v2493_v14 = vpop.eup %2492 }
 0x68e   :  { %801 = vrot.lane.b32.xlu1 %v2493_v14, %s2768_s19 }
 0x691   :  { %v2495_v23 = vpop.eup %2494 }
 0x692   :  { %830 = vrot.lane.b32.xlu0 %v2495_v23, %s2768_s19  ;;  %796 = vrot.lane.b32.xlu1 %v795_v20, %s2775_s0  ;;  %v2497_v12 = vpop.eup %2496 }
 0x693   :  { %v790_v28 = vadd.f32 1.0, %v2497_v12  ;;  %v2499_v31 = vpop.eup %2498 }
 0x694   :  { %v819_v32 = vadd.f32 1.0, %v2499_v31 }
 0x695   :  { %2500 = vrcp.f32 %v790_v28 }
 0x696   :  { %825 = vrot.lane.b32.xlu0 %v824_v25, %s2775_s0  ;;  %2502 = vrcp.f32 %v819_v32 }
 0x6a2   :  { %v2501_v47 = vpop.eup %2500 }
 0x6a3   :  { %v2503_v37 = vpop.eup %2502 }
 0x700   :  { %v802_v33 = vpop.permute.xlu1 %801 }
 0x701   :  { %v804_v36 = vmul.f32 %v2501_v47, %v802_v33 }
 0x703   :  { %806 = vrot.lane.b32.xlu1 %v804_v36, %s2775_s0 }
 0x704   :  { %v831_v40 = vpop.permute.xlu0 %830  ;;  %v797_v42 = vpop.permute.xlu1 %796 }
 0x705   :  { %v833_v41 = vmul.f32 %v2503_v37, %v831_v40  ;;  %v799_v43 = vmul.f32 %v2501_v47, %v797_v42 }
 0x707   :  { %835 = vrot.lane.b32.xlu0 %v833_v41, %s2775_s0 }
 0x708   :  { %v826_v44 = vpop.permute.xlu0 %825 }
 0x709   :  { %v828_v49 = vmul.f32 %v2503_v37, %v826_v44 }
 0x775   :  { %v807_v45 = vpop.permute.xlu1 %806 }
 0x776   :  { %v809_v48 = vadd.f32 %v807_v45, %v799_v43 }
 0x778   :  { %2504 = vtanh.f32 %v809_v48  ;;  %v859_v61 = vrot.slane %v809_v48, 4 }
 0x779   :  { %v836_v50 = vpop.permute.xlu0 %835 }
 0x77a   :  { %v838_v51 = vadd.f32 %v836_v50, %v828_v49 }
 0x77c   :  { %2506 = vtanh.f32 %v838_v51  ;;  %v876_v63 = vrot.slane %v838_v51, 2 }
 0x785   :  { %v2505_v22 = vpop.eup %2504 }
 0x786   :  { %812 = vrot.lane.b32.xlu1 %v2505_v22, %s2768_s19 }
 0x789   :  { %v2507_v53 = vpop.eup %2506 }
 0x78a   :  { %841 = vrot.lane.b32.xlu0 %v2507_v53, %s2768_s19  ;;  %849 = vperm.xlu1 %2448, %v847_v52  }
 0x78e   :  { %866 = vperm.xlu0 %2447, %v864_v54  }
 0x7f8   :  { %v813_v55 = vpop.permute.xlu1 %812 }
 0x7f9   :  { %v815_v56 = vmul.f32 %v2501_v47, %v813_v55 }
 0x7fb   :  { %v853_v57 = vrot.slane %v815_v56, 4 }
 0x7fc   :  { %v842_v58 = vpop.permute.xlu0 %841 }
 0x7fd   :  { %v844_v60 = vmul.f32 %v2503_v37, %v842_v58  ;;  %854 = vrot.lane.b32.xlu1 %v853_v57, %s2775_s0 }
 0x7ff   :  { %v870_v62 = vrot.slane %v844_v60, 2 }
 0x801   :  { %871 = vrot.lane.b32.xlu0 %v870_v62, %s2775_s0  ;;  %860 = vrot.lane.b32.xlu1 %v859_v61, %s2776_s11 }
 0x805   :  { %877 = vrot.lane.b32.xlu0 %v876_v63, %s2776_s11  ;;  %v3079_v3 = vpop.permute.xlu1 %849 }
 0x806   :  { %vm851_vm13 = vcmp.eq.s32.totalorder %v3079_v3, 1 }
 0x809   :  { %v3082_v4 = vpop.permute.xlu0 %866 }
 0x80a   :  { %vm868_vm14 = vcmp.eq.s32.totalorder %v3082_v4, 1 }
 0x86f   :  { %v855_v6 = vpop.permute.xlu1 %854 }
 0x870   :  { %v3087_v8 = vsel %vm851_vm13, %v855_v6, %v3010_v39  ;;  %v881_v13 = vsel %vm851_vm13, %v855_v6, 0.0  ;;  %v1106_v6 = vsel %vm1088_vm15, 1, %v2773_v1 }
 0x871   :  { %v889_v14 = vrot.slane %v881_v13, %v2946_v19  ;;  %v937_v17 = vpack.c.bf16 %v3087_v8, %v3087_v8 }
 0x873   :  { %v890_v20 = vcombine.high %v889_v14, %v889_v14  ;;  %v897_v23 = vrot.slane %v889_v14, %v2946_v19  ;;  %v872_v25 = vpop.permute.xlu0 %871  ;;  %2354 = vmatmul.mubr.msk.bf16.vlgmr.msra.gmra.mxu1 %vm130_vm1, %v937_v17  ;;  %v861_v49 = vpop.permute.xlu1 %860 }
 0x874   :  { %v3100_v39 = vsel %vm868_vm14, %v872_v25, %v3023_v46  ;;  %v909_v26 = vsel %vm868_vm14, %v872_v25, 0.0  ;;  %2366 = vmatpush3.bf16.msra.mxu1 %v2859_v5  ;;  %2369 = vmatprep.mubr.msk.bf16.mxu1 %vm2774_vm0, %v2772_v0  ;;  %v3132_v51 = vsel %vm851_vm13, %v861_v49, %v3054_v16 }
 0x875   :  { %v904_v27 = vrot.slane %v890_v20, %v2946_v19  ;;  %907 = vst.msk [vmem:[#allocation10 + $0x2] sm:$0x1] %vm408_vm6, %v897_v23  ;;  %v917_v12 = vrot.slane %v909_v26, %v2946_v19  ;;  %v981_v28 = vpack.c.bf16 %v3100_v39, %v3100_v39  ;;  %2367 = vmatprep.subr.bf16.mxu1 %v2772_v0  ;;  %v1038_v22 = vrot.slane %v3132_v51, 2 }
 0x877   :  { %908 = vst.msk [vmem:[#allocation10 + $0xa] sm:$0x1] %vm408_vm6, %v904_v27  ;;  %v918_v46 = vcombine.high %v917_v12, %v917_v12  ;;  %v925_v31 = vrot.slane %v917_v12, %v2946_v19  ;;  %2362 = vmatmul.mubr.msk.bf16.vlgmr.msra.gmra.mxu0 %vm130_vm1, %v981_v28  ;;  %v878_v52 = vpop.permute.xlu0 %877  ;;  %v1089_v28 = vsel %vm1087_vm2, 1, %v2773_v1 }
 0x878   :  { %2374 = vmatpush3.bf16.msra.mxu0 %v2865_v9  ;;  %2368 = vmatpush3.bf16.msra.mxu1 %v2862_v7 }
 0x879   :  { %v932_v32 = vrot.slane %v918_v46, %v2946_v19  ;;  %935 = vst.msk [vmem:[#allocation11 + $0x5] sm:$0x1] %vm408_vm6, %v925_v31  ;;  %2375 = vmatprep.subr.bf16.mxu0 %v2772_v0  ;;  %2377 = vmatprep.mubr.msk.bf16.mxu0 %vm2774_vm0, %v2772_v0 }
 0x87a   :  { %2381 = vmatprep.subr.bf16.mxu1 %v2772_v0 }
 0x87b   :  { %936 = vst.msk [vmem:[#allocation11 + $0xd] sm:$0x1] %vm408_vm6, %v932_v32 }
 0x87c   :  { %2376 = vmatpush3.bf16.msra.mxu0 %v2872_v10 }
 0x87d   :  { %2389 = vmatprep.subr.bf16.mxu0 %v2772_v0 }
 0x933   :  { %v975_v47 = vpop.f32.mrf.mxu1 }
 0x934   :  { %v1026_v33 = vrot.slane %v975_v47, 2 }
 0x935   :  { %v2355_v36 = vpop.f32.mrf.mxu1 }
 0x936   :  { %v1028_v37 = vadd.f32 %v1026_v33, %v2907_v29 }
 0x937   :  { %v978_v40 = vpop.f32.mrf.mxu1  ;;  %v1019_v41 = vpop.f32.mrf.mxu0 }
 0x938   :  { %2508 = vtanh.f32 %v1028_v37  ;;  %v1029_v42 = vadd.f32 %v1019_v41, %v2909_v30  ;;  %v880_v30 = vsel %vm868_vm14, %v878_v52, %v3061_v59  ;;  %v2235_v53 = vmul.f32 -1.442695, %v1028_v37 }
 0x939   :  { %v2356_v43 = vpop.f32.mrf.mxu1  ;;  %v2363_v44 = vpop.f32.mrf.mxu0 }
 0x93a   :  { %2510 = vtanh.f32 %v1029_v42  ;;  %v2236_v54 = vmul.f32 -1.442695, %v1029_v42 }
 0x93b   :  { %v1022_v45 = vpop.f32.mrf.mxu0  ;;  %2512 = vpow2.f32 %v2235_v53 }
 0x93c   :  { %2514 = vpow2.f32 %v2236_v54 }
 0x93d   :  { %v2364_v48 = vpop.f32.mrf.mxu0 }
 0x945   :  { %v2509_v50 = vpop.eup %2508 }
 0x946   :  { %1044 = vrot.lane.b32.xlu0 %v2509_v50, %s2768_s19 }
 0x947   :  { %v2511_v29 = vpop.eup %2510 }
 0x948   :  { %1072 = vrot.lane.b32.xlu1 %v2511_v29, %s2768_s19  ;;  %v2513_v16 = vpop.eup %2512 }
 0x949   :  { %v2515_v55 = vpop.eup %2514  ;;  %v1033_v56 = vadd.f32 1.0, %v2513_v16 }
 0x94a   :  { %1039 = vrot.lane.b32.xlu0 %v1038_v22, %s2775_s0  ;;  %v1062_v57 = vadd.f32 1.0, %v2515_v55 }
 0x94b   :  { %2516 = vrcp.f32 %v1033_v56 }
 0x94c   :  { %1067 = vrot.lane.b32.xlu1 %v880_v30, %s2775_s0  ;;  %2518 = vrcp.f32 %v1062_v57 }
 0x958   :  { %v2517_v58 = vpop.eup %2516 }
 0x959   :  { %v2519_v62 = vpop.eup %2518 }
 0x9b8   :  { %v1045_v60 = vpop.permute.xlu0 %1044 }
 0x9b9   :  { %v1047_v61 = vmul.f32 %v2517_v58, %v1045_v60 }
 0x9ba   :  { %v1073_v63 = vpop.permute.xlu1 %1072 }
 0x9bb   :  { %1049 = vrot.lane.b32.xlu0 %v1047_v61, %s2775_s0  ;;  %v1075_v59 = vmul.f32 %v2519_v62, %v1073_v63 }
 0x9bc   :  { %v1040_v13 = vpop.permute.xlu0 %1039 }
 0x9bd   :  { %1077 = vrot.lane.b32.xlu1 %v1075_v59, %s2775_s0  ;;  %v1042_v14 = vmul.f32 %v2517_v58, %v1040_v13 }
 0x9be   :  { %v3146_v17 = vpop.permute.xlu1 %1067 }
 0x9bf   :  { %v1070_v25 = vmul.f32 %v2519_v62, %v3146_v17 }
 0x9c1   :  { %1108 = vperm.xlu1 %2448, %v1106_v6  }
 0xa2d   :  { %v1050_v20 = vpop.permute.xlu0 %1049 }
 0xa2e   :  { %v1052_v23 = vadd.f32 %v1050_v20, %v1042_v14 }
 0xa2f   :  { %v1078_v26 = vpop.permute.xlu1 %1077 }
 0xa30   :  { %2520 = vtanh.f32 %v1052_v23  ;;  %v3149_v27 = vadd.f32 %v1078_v26, %v1070_v25  ;;  %v1101_v37 = vrot.slane %v1052_v23, 6 }
 0xa32   :  { %2522 = vtanh.f32 %v3149_v27 }
 0xa3c   :  { %v3158_v31 = vpop.permute.xlu1 %1108 }
 0xa3d   :  { %v2521_v12 = vpop.eup %2520  ;;  %vm1110_vm3 = vcmp.eq.s32.totalorder %v3158_v31, 1 }
 0xa3e   :  { %1055 = vrot.lane.b32.xlu1 %v2521_v12, %s2768_s19 }
 0xa3f   :  { %v2523_v46 = vpop.eup %2522 }
 0xa40   :  { %1083 = vrot.lane.b32.xlu0 %v2523_v46, %s2768_s19  ;;  %v1116_v46 = vsel %vm1110_vm3, %v3149_v27, %v3146_v17 }
 0xa42   :  { %1091 = vperm.xlu1 %2448, %v1089_v28  }
 0xa44   :  { %1112 = vrot.lane.b32.xlu0 %v3100_v39, %s2776_s11 }
 0xab0   :  { %v1056_v32 = vpop.permute.xlu1 %1055 }
 0xab1   :  { %v1058_v47 = vmul.f32 %v2517_v58, %v1056_v32 }
 0xab2   :  { %v1084_v36 = vpop.permute.xlu0 %1083 }
 0xab3   :  { %v1095_v33 = vrot.slane %v1058_v47, 6  ;;  %v3161_v38 = vmul.f32 %v2519_v62, %v1084_v36 }
 0xab5   :  { %1096 = vrot.lane.b32.xlu0 %v1095_v33, %s2775_s0  ;;  %v1317_v33 = vrot.slane %v1116_v46, 2 }
 0xab6   :  { %v1113_v1 = vpop.permute.xlu0 %1112 }
 0xab7   :  { %v3167_v40 = vsel %vm1110_vm3, %v3161_v38, %v1113_v1 }
 0xab8   :  { %v1229_v39 = vpack.c.bf16 %v3167_v40, %v3167_v40 }
 0xab9   :  { %1102 = vrot.lane.b32.xlu0 %v1101_v37, %s2776_s11 }
 0xaba   :  { %1231 = vrot.lane.b32.xlu1 %v1229_v39, %s2775_s0 }
 0xabd   :  { %v3173_v41 = vpop.permute.xlu1 %1091 }
 0xabe   :  { %vm1093_vm7 = vcmp.eq.s32.totalorder %v3173_v41, 1 }
 0xb27   :  { %v1097_v42 = vpop.permute.xlu0 %1096 }
 0xb28   :  { %v3179_v43 = vsel %vm1093_vm7, %v1097_v42, %v3087_v8  ;;  %v1117_v44 = vsel %vm1093_vm7, %v1097_v42, 0.0 }
 0xb29   :  { %v1125_v45 = vrot.slane %v1117_v44, %v2946_v19  ;;  %v1185_v48 = vpack.c.bf16 %v3179_v43, %v3179_v43 }
 0xb2b   :  { %v1126_v49 = vcombine.high %v1125_v45, %v1125_v45  ;;  %v1133_v50 = vrot.slane %v1125_v45, %v2946_v19  ;;  %2370 = vmatmul.mubr.msk.bf16.vlgmr.msra.gmra.mxu1 %vm130_vm1, %v1185_v48  ;;  %v1103_v58 = vpop.permute.xlu0 %1102 }
 0xb2c   :  { %2382 = vmatpush3.bf16.msra.mxu1 %v2859_v5  ;;  %2385 = vmatprep.mubr.msk.bf16.mxu1 %vm2774_vm0, %v2772_v0  ;;  %v1232_v29 = vpop.permute.xlu1 %1231  ;;  %v1105_v60 = vsel %vm1093_vm7, %v1103_v58, %v3132_v51 }
 0xb2d   :  { %v1140_v8 = vrot.slane %v1126_v49, %v2946_v19  ;;  %1143 = vst.msk [vmem:[#allocation10 + $0x3] sm:$0x1] %vm408_vm6, %v1133_v50  ;;  %2383 = vmatprep.subr.bf16.mxu1 %v2772_v0  ;;  %2378 = vmatmul.mubr.msk.bf16.vlgmr.msra.gmra.mxu0 %vm130_vm1, %v1232_v29 }
 0xb2e   :  { %2390 = vmatpush3.bf16.msra.mxu0 %v2865_v9  ;;  %2393 = vmatprep.mubr.msk.bf16.mxu0 %vm2774_vm0, %v2772_v0 }
 0xb2f   :  { %1144 = vst.msk [vmem:[#allocation10 + $0xb] sm:$0x1] %vm408_vm6, %v1140_v8  ;;  %2391 = vmatprep.subr.bf16.mxu0 %v2772_v0 }
 0xb30   :  { %2384 = vmatpush3.bf16.msra.mxu1 %v2862_v7 }
 0xb31   :  { %2397 = vmatprep.subr.bf16.mxu1 %v2772_v0 }
 0xb32   :  { %2392 = vmatpush3.bf16.msra.mxu0 %v2872_v10 }
 0xb33   :  { %2405 = vmatprep.subr.bf16.mxu0 %v2772_v0 }
 0xbeb   :  { %v1223_v5 = vpop.f32.mrf.mxu1 }
 0xbec   :  { %v1276_v22 = vadd.f32 %v1223_v5, %v2905_v24 }
 0xbed   :  { %v2371_v52 = vpop.f32.mrf.mxu1  ;;  %v1270_v30 = vpop.f32.mrf.mxu0 }
 0xbee   :  { %2524 = vtanh.f32 %v1276_v22  ;;  %v1278_v9 = vrot.slane %v1270_v30, 2  ;;  %v2239_v61 = vmul.f32 -1.442695, %v1276_v22 }
 0xbef   :  { %v1226_v53 = vpop.f32.mrf.mxu1  ;;  %v2379_v54 = vpop.f32.mrf.mxu0 }
 0xbf0   :  { %v1280_v16 = vadd.f32 %v1278_v9, %v2903_v21 }
 0xbf1   :  { %v2372_v55 = vpop.f32.mrf.mxu1  ;;  %v1273_v56 = vpop.f32.mrf.mxu0 }
 0xbf2   :  { %2526 = vtanh.f32 %v1280_v16  ;;  %v2240_v62 = vmul.f32 -1.442695, %v1280_v16  ;;  %v3255_v16 = vld [vmem:[#allocation8 + $0x8] sm:$0xff]   ;;  %v3260_v56 = vld [vmem:[#allocation7 + $0x8] sm:$0xff]  }
 0xbf3   :  { %v2380_v7 = vpop.f32.mrf.mxu0  ;;  %2528 = vpow2.f32 %v2239_v61 }
 0xbf4   :  { %2530 = vpow2.f32 %v2240_v62  ;;  %v3270_v7 = vld [vmem:[#allocation8] sm:$0xff]  }
 0xbfb   :  { %v2525_v57 = vpop.eup %2524 }
 0xbfc   :  { %1294 = vrot.lane.b32.xlu0 %v2525_v57, %s2768_s19  ;;  %v3273_v57 = vld [vmem:[#allocation7] sm:$0xff]  }
 0xbff   :  { %v2527_v10 = vpop.eup %2526 }
 0xc00   :  { %1321 = vrot.lane.b32.xlu1 %v2527_v10, %s2768_s19  ;;  %v2529_v63 = vpop.eup %2528 }
 0xc01   :  { %v1284_v59 = vadd.f32 1.0, %v2529_v63  ;;  %v2531_v6 = vpop.eup %2530 }
 0xc02   :  { %v1312_v13 = vadd.f32 1.0, %v2531_v6 }
 0xc03   :  { %2532 = vrcp.f32 %v1284_v59 }
 0xc04   :  { %1289 = vrot.lane.b32.xlu1 %v1105_v60, %s2775_s0  ;;  %2534 = vrcp.f32 %v1312_v13 }
 0xc10   :  { %v2533_v14 = vpop.eup %2532 }
 0xc11   :  { %v2535_v25 = vpop.eup %2534 }
 0xc12   :  { %v1319_v36 = vmul.f32 %v2535_v25, %v1317_v33 }
 0xc6e   :  { %v1295_v20 = vpop.permute.xlu0 %1294 }
 0xc6f   :  { %v1297_v23 = vmul.f32 %v2533_v14, %v1295_v20 }
 0xc71   :  { %1299 = vrot.lane.b32.xlu1 %v1297_v23, %s2775_s0 }
 0xc72   :  { %v1322_v26 = vpop.permute.xlu1 %1321 }
 0xc73   :  { %v1324_v51 = vmul.f32 %v2535_v25, %v1322_v26 }
 0xc75   :  { %1326 = vrot.lane.b32.xlu0 %v1324_v51, %s2775_s0 }
 0xc76   :  { %v3214_v12 = vpop.permute.xlu1 %1289 }
 0xc77   :  { %v1292_v28 = vmul.f32 %v2533_v14, %v3214_v12 }
 0xce3   :  { %v1300_v32 = vpop.permute.xlu1 %1299 }
 0xce4   :  { %v3221_v47 = vadd.f32 %v1300_v32, %v1292_v28 }
 0xce6   :  { %2536 = vtanh.f32 %v3221_v47 }
 0xce7   :  { %v1327_v37 = vpop.permute.xlu0 %1326 }
 0xce8   :  { %v1329_v1 = vadd.f32 %v1327_v37, %v1319_v36 }
 0xcea   :  { %2538 = vtanh.f32 %v1329_v1  ;;  %v1353_v17 = vrot.slane %v1329_v1, 6 }
 0xcf3   :  { %v2537_v39 = vpop.eup %2536 }
 0xcf4   :  { %1305 = vrot.lane.b32.xlu1 %v2537_v39, %s2768_s19 }
 0xcf7   :  { %v2539_v42 = vpop.eup %2538 }
 0xcf8   :  { %1332 = vrot.lane.b32.xlu0 %v2539_v42, %s2768_s19 }
 0xcfc   :  { %1337 = vrot.lane.b32.xlu0 %v3179_v43, %s2776_s11 }
 0xd00   :  { %1348 = vrot.lane.b32.xlu0 %v3167_v40, %s2775_s0 }
 0xd04   :  { %1354 = vrot.lane.b32.xlu0 %v1353_v17, %s2776_s11 }
 0xd66   :  { %v1306_v27 = vpop.permute.xlu1 %1305 }
 0xd67   :  { %v3231_v48 = vmul.f32 %v2533_v14, %v1306_v27 }
 0xd6a   :  { %v1333_v44 = vpop.permute.xlu0 %1332 }
 0xd6b   :  { %v1335_v45 = vmul.f32 %v2535_v25, %v1333_v44 }
 0xd6d   :  { %v1343_v49 = vrot.slane %v1335_v45, 6 }
 0xd6e   :  { %v1338_v50 = vpop.permute.xlu0 %1337 }
 0xd6f   :  { %v3236_v8 = vsel %vm1110_vm3, %v3231_v48, %v1338_v50  ;;  %1344 = vrot.lane.b32.xlu1 %v1343_v49, %s2775_s0  ;;  %v1341_v50 = vsel %vm1110_vm3, %v3221_v47, %v3214_v12 }
 0xd70   :  { %v1429_v40 = vpack.c.bf16 %v3236_v8, %v3236_v8 }
 0xd72   :  { %v1349_v43 = vpop.permute.xlu0 %1348 }
 0xd73   :  { %1431 = vrot.lane.b32.xlu1 %v1429_v40, %s2775_s0 }
 0xd76   :  { %v1355_v51 = vpop.permute.xlu0 %1354 }
 0xd77   :  { %1357 = vrot.lane.b32.xlu1 %v1116_v46, %s2776_s11 }
 0xde1   :  { %v1345_v29 = vpop.permute.xlu1 %1344 }
 0xde2   :  { %v3245_v5 = vsel %vm1093_vm7, %v1345_v29, %v1349_v43  ;;  %v1401_v22 = vsel %vm1093_vm7, %v1345_v29, 0.0  ;;  %v1536_v43 = vrot.slane %v1341_v50, 6 }
 0xde3   :  { %v1409_v52 = vrot.slane %v1401_v22, %v2946_v19  ;;  %v1476_v30 = vpack.c.bf16 %v3245_v5, %v3245_v5 }
 0xde5   :  { %v1410_v9 = vcombine.high %v1409_v52, %v1409_v52  ;;  %v1417_v53 = vrot.slane %v1409_v52, %v2946_v19  ;;  %2394 = vmatmul.mubr.msk.bf16.vlgmr.msra.gmra.mxu0 %vm130_vm1, %v1476_v30  ;;  %v1432_v54 = vpop.permute.xlu1 %1431 }
 0xde6   :  { %2386 = vmatmul.mubr.msk.bf16.vlgmr.msra.gmra.mxu1 %vm130_vm1, %v1432_v54  ;;  %2406 = vmatpush3.bf16.msra.mxu0 %v3255_v16 }
 0xde7   :  { %v1424_v55 = vrot.slane %v1410_v9, %v2946_v19  ;;  %1427 = vst.msk [vmem:[#allocation11 + $0x3] sm:$0x1] %vm408_vm6, %v1417_v53  ;;  %2398 = vmatpush3.bf16.msra.mxu1 %v3260_v56  ;;  %2401 = vmatprep.mubr.msk.bf16.mxu1 %vm2774_vm0, %v2772_v0 }
 0xde8   :  { %2399 = vmatprep.subr.bf16.mxu1 %v2772_v0  ;;  %2407 = vmatprep.subr.bf16.mxu0 %v2772_v0 }
 0xde9   :  { %1428 = vst.msk [vmem:[#allocation11 + $0xb] sm:$0x1] %vm408_vm6, %v1424_v55  ;;  %2409 = vmatprep.mubr.msk.bf16.mxu0 %vm2774_vm0, %v2772_v0  ;;  %v1358_v25 = vpop.permute.xlu1 %1357 }
 0xdea   :  { %2408 = vmatpush3.bf16.msra.mxu0 %v3270_v7  ;;  %v3282_v46 = vsel %vm1093_vm7, %v1355_v51, %v1358_v25 }
 0xdeb   :  { %2400 = vmatpush3.bf16.msra.mxu1 %v3273_v57  ;;  %2421 = vmatprep.subr.bf16.mxu0 %v2772_v0  ;;  %v1563_v32 = vrot.slane %v3282_v46, 4 }
 0xdec   :  { %2413 = vmatprep.subr.bf16.mxu1 %v2772_v0 }
 0xea5   :  { %v1514_v10 = vpop.f32.mrf.mxu0 }
 0xea6   :  { %v1525_v58 = vrot.slane %v1514_v10, 4  ;;  %v1470_v60 = vpop.f32.mrf.mxu1 }
 0xea7   :  { %v1521_v61 = vrot.slane %v1470_v60, 6  ;;  %v2395_v62 = vpop.f32.mrf.mxu0 }
 0xea8   :  { %v1527_v63 = vadd.f32 %v1525_v58, %v2903_v21  ;;  %v2387_v59 = vpop.f32.mrf.mxu1 }
 0xea9   :  { %v1523_v6 = vadd.f32 %v1521_v61, %v2905_v24  ;;  %v1517_v13 = vpop.f32.mrf.mxu0 }
 0xeaa   :  { %2540 = vtanh.f32 %v1527_v63  ;;  %v1473_v14 = vpop.f32.mrf.mxu1  ;;  %v2244_v33 = vmul.f32 -1.442695, %v1527_v63 }
 0xeab   :  { %2542 = vtanh.f32 %v1523_v6  ;;  %v2396_v20 = vpop.f32.mrf.mxu0  ;;  %v2243_v36 = vmul.f32 -1.442695, %v1523_v6 }
 0xeac   :  { %v2388_v23 = vpop.f32.mrf.mxu1  ;;  %2544 = vpow2.f32 %v2244_v33 }
 0xead   :  { %2546 = vpow2.f32 %v2243_v36 }
 0xeb7   :  { %v2541_v26 = vpop.eup %2540 }
 0xeb8   :  { %v2543_v28 = vpop.eup %2542  ;;  %1569 = vrot.lane.b32.xlu1 %v2541_v26, %s2768_s19 }
 0xeb9   :  { %1540 = vrot.lane.b32.xlu0 %v2543_v28, %s2768_s19  ;;  %v2545_v37 = vpop.eup %2544 }
 0xeba   :  { %v2547_v1 = vpop.eup %2546  ;;  %v1558_v39 = vadd.f32 1.0, %v2545_v37 }
 0xebb   :  { %v1531_v42 = vadd.f32 1.0, %v2547_v1 }
 0xebc   :  { %2548 = vrcp.f32 %v1558_v39 }
 0xebd   :  { %1564 = vrot.lane.b32.xlu0 %v1563_v32, %s2775_s0  ;;  %2550 = vrcp.f32 %v1531_v42 }
 0xec9   :  { %v2549_v41 = vpop.eup %2548 }
 0xeca   :  { %v2551_v27 = vpop.eup %2550 }
 0xecb   :  { %v1538_v52 = vmul.f32 %v2551_v27, %v1536_v43 }
 0xf2a   :  { %v1570_v17 = vpop.permute.xlu1 %1569 }
 0xf2b   :  { %v1572_v44 = vmul.f32 %v2549_v41, %v1570_v17  ;;  %v1541_v45 = vpop.permute.xlu0 %1540 }
 0xf2c   :  { %v1543_v49 = vmul.f32 %v2551_v27, %v1541_v45 }
 0xf2d   :  { %1574 = vrot.lane.b32.xlu0 %v1572_v44, %s2775_s0 }
 0xf2e   :  { %1545 = vrot.lane.b32.xlu1 %v1543_v49, %s2775_s0 }
 0xf2f   :  { %v1565_v40 = vpop.permute.xlu0 %1564 }
 0xf30   :  { %v1567_v29 = vmul.f32 %v2549_v41, %v1565_v40 }
 0xf9f   :  { %v1575_v22 = vpop.permute.xlu0 %1574 }
 0xfa0   :  { %v1577_v30 = vadd.f32 %v1575_v22, %v1567_v29  ;;  %v1546_v9 = vpop.permute.xlu1 %1545 }
 0xfa1   :  { %v1548_v53 = vadd.f32 %v1546_v9, %v1538_v52 }
 0xfa2   :  { %2552 = vtanh.f32 %v1577_v30  ;;  %v1610_v47 = vrot.slane %v1577_v30, 4 }
 0xfa3   :  { %2554 = vtanh.f32 %v1548_v53  ;;  %v1595_v12 = vrot.slane %v1548_v53, 2 }
 0xfaf   :  { %v2553_v54 = vpop.eup %2552 }
 0xfb0   :  { %v2555_v55 = vpop.eup %2554  ;;  %1580 = vrot.lane.b32.xlu0 %v2553_v54, %s2768_s19 }
 0xfb1   :  { %1551 = vrot.lane.b32.xlu1 %v2555_v55, %s2768_s19 }
 0xfb4   :  { %1590 = vrot.lane.b32.xlu0 %v3236_v8, %s2775_s0 }
 0xfb8   :  { %1596 = vrot.lane.b32.xlu0 %v1595_v12, %s2776_s11 }
 0xfbc   :  { %1611 = vrot.lane.b32.xlu0 %v1610_v47, %s2776_s11 }
0x1022   :  { %v1581_v10 = vpop.permute.xlu0 %1580 }
0x1023   :  { %v1552_v58 = vpop.permute.xlu1 %1551  ;;  %v1583_v61 = vmul.f32 %v2549_v41, %v1581_v10 }
0x1024   :  { %v1554_v60 = vmul.f32 %v2551_v27, %v1552_v58 }
0x1025   :  { %v1604_v63 = vrot.slane %v1583_v61, 4 }
0x1026   :  { %v1585_v62 = vrot.slane %v1554_v60, 2  ;;  %v1591_v59 = vpop.permute.xlu0 %1590 }
0x1028   :  { %1586 = vrot.lane.b32.xlu1 %v1585_v62, %s2775_s0 }
0x102c   :  { %1605 = vrot.lane.b32.xlu1 %v1604_v63, %s2775_s0 }
0x1030   :  { %1599 = vrot.lane.b32.xlu1 %v1341_v50, %s2776_s11  ;;  %v1597_v50 = vpop.permute.xlu0 %1596 }
0x1034   :  { %v1612_v29 = vpop.permute.xlu0 %1611 }
0x1035   :  { %v3353_v30 = vsel %vm851_vm13, %v1612_v29, %v3282_v46 }
0x1036   :  { %v1804_v9 = vrot.slane %v3353_v30, 6 }
0x109a   :  { %v1587_v8 = vpop.permute.xlu1 %1586 }
0x109b   :  { %v3305_v6 = vsel %vm868_vm14, %v1587_v8, %v1591_v59  ;;  %v1615_v13 = vsel %vm868_vm14, %v1587_v8, 0.0 }
0x109c   :  { %v1623_v14 = vrot.slane %v1615_v13, %v2946_v19  ;;  %v1671_v20 = vpack.c.bf16 %v3305_v6, %v3305_v6 }
0x109e   :  { %v1624_v23 = vcombine.high %v1623_v14, %v1623_v14  ;;  %v1631_v25 = vrot.slane %v1623_v14, %v2946_v19  ;;  %2402 = vmatmul.mubr.msk.bf16.vlgmr.msra.gmra.mxu1 %vm130_vm1, %v1671_v20  ;;  %v1606_v26 = vpop.permute.xlu1 %1605 }
0x109f   :  { %v3317_v51 = vsel %vm851_vm13, %v1606_v26, %v3245_v5  ;;  %v1643_v28 = vsel %vm851_vm13, %v1606_v26, 0.0  ;;  %2414 = vmatpush3.bf16.msra.mxu1 %v3260_v56  ;;  %2417 = vmatprep.mubr.msk.bf16.mxu1 %vm2774_vm0, %v2772_v0 }
0x10a0   :  { %v1638_v32 = vrot.slane %v1624_v23, %v2946_v19  ;;  %1641 = vst.msk [vmem:[#allocation10 + $0x5] sm:$0x1] %vm408_vm6, %v1631_v25  ;;  %v1651_v33 = vrot.slane %v1643_v28, %v2946_v19  ;;  %v1715_v36 = vpack.c.bf16 %v3317_v51, %v3317_v51  ;;  %2415 = vmatprep.subr.bf16.mxu1 %v2772_v0 }
0x10a2   :  { %1642 = vst.msk [vmem:[#allocation10 + $0xd] sm:$0x1] %vm408_vm6, %v1638_v32  ;;  %v1652_v5 = vcombine.high %v1651_v33, %v1651_v33  ;;  %v1659_v37 = vrot.slane %v1651_v33, %v2946_v19  ;;  %2410 = vmatmul.mubr.msk.bf16.vlgmr.msra.gmra.mxu0 %vm130_vm1, %v1715_v36  ;;  %v1600_v40 = vpop.permute.xlu1 %1599 }
0x10a3   :  { %2416 = vmatpush3.bf16.msra.mxu1 %v3273_v57  ;;  %2422 = vmatpush3.bf16.msra.mxu0 %v3255_v16 }
0x10a4   :  { %v1666_v56 = vrot.slane %v1652_v5, %v2946_v19  ;;  %1669 = vst.msk [vmem:[#allocation11 + $0x2] sm:$0x1] %vm408_vm6, %v1659_v37  ;;  %2423 = vmatprep.subr.bf16.mxu0 %v2772_v0  ;;  %2425 = vmatprep.mubr.msk.bf16.mxu0 %vm2774_vm0, %v2772_v0  ;;  %vm2141_vm0 = vcmask 254976  }
0x10a6   :  { %1670 = vst.msk [vmem:[#allocation11 + $0xa] sm:$0x1] %vm408_vm6, %v1666_v56 }
0x10a7   :  { %2424 = vmatpush3.bf16.msra.mxu0 %v3270_v7  ;;  %v3346_v7 = vsel %vm868_vm14, %v1597_v50, %v1600_v40 }
0x10a8   :  { %v1775_v22 = vrot.slane %v3346_v7, 4 }
0x115e   :  { %v1709_v1 = vpop.f32.mrf.mxu1 }
0x115f   :  { %v1760_v39 = vrot.slane %v1709_v1, 4 }
0x1160   :  { %v2403_v42 = vpop.f32.mrf.mxu1 }
0x1161   :  { %v1762_v57 = vadd.f32 %v1760_v39, %v2905_v24 }
0x1162   :  { %v1712_v41 = vpop.f32.mrf.mxu1  ;;  %v1753_v16 = vpop.f32.mrf.mxu0 }
0x1163   :  { %2556 = vtanh.f32 %v1762_v57  ;;  %v1764_v17 = vrot.slane %v1753_v16, 6  ;;  %v2247_v4 = vmul.f32 -1.442695, %v1762_v57 }
0x1164   :  { %v2404_v27 = vpop.f32.mrf.mxu1  ;;  %v2411_v44 = vpop.f32.mrf.mxu0 }
0x1165   :  { %v1766_v45 = vadd.f32 %v1764_v17, %v2903_v21 }
0x1166   :  { %v1756_v49 = vpop.f32.mrf.mxu0 }
0x1167   :  { %2558 = vtanh.f32 %v1766_v45  ;;  %v2248_v53 = vmul.f32 -1.442695, %v1766_v45 }
0x1168   :  { %v2412_v0 = vpop.f32.mrf.mxu0  ;;  %2560 = vpow2.f32 %v2247_v4 }
0x1169   :  { %2562 = vpow2.f32 %v2248_v53 }
0x1170   :  { %v2557_v43 = vpop.eup %2556 }
0x1171   :  { %1781 = vrot.lane.b32.xlu1 %v2557_v43, %s2768_s19 }
0x1174   :  { %v2559_v52 = vpop.eup %2558 }
0x1175   :  { %1810 = vrot.lane.b32.xlu0 %v2559_v52, %s2768_s19  ;;  %1776 = vrot.lane.b32.xlu1 %v1775_v22, %s2775_s0  ;;  %v2561_v54 = vpop.eup %2560 }
0x1176   :  { %v1770_v55 = vadd.f32 1.0, %v2561_v54  ;;  %v2563_v12 = vpop.eup %2562 }
0x1177   :  { %v1799_v47 = vadd.f32 1.0, %v2563_v12 }
0x1178   :  { %2564 = vrcp.f32 %v1770_v55 }
0x1179   :  { %1805 = vrot.lane.b32.xlu0 %v1804_v9, %s2775_s0  ;;  %2566 = vrcp.f32 %v1799_v47 }
0x1185   :  { %v2565_v3 = vpop.eup %2564 }
0x1186   :  { %v2567_v58 = vpop.eup %2566 }
0x11e3   :  { %v1782_v46 = vpop.permute.xlu1 %1781 }
0x11e4   :  { %v1784_v10 = vmul.f32 %v2565_v3, %v1782_v46 }
0x11e6   :  { %1786 = vrot.lane.b32.xlu1 %v1784_v10, %s2775_s0 }
0x11e7   :  { %v1811_v60 = vpop.permute.xlu0 %1810  ;;  %v1777_v62 = vpop.permute.xlu1 %1776 }
0x11e8   :  { %v1813_v61 = vmul.f32 %v2567_v58, %v1811_v60  ;;  %v1779_v63 = vmul.f32 %v2565_v3, %v1777_v62 }
0x11ea   :  { %1815 = vrot.lane.b32.xlu0 %v1813_v61, %s2775_s0 }
0x11eb   :  { %v1806_v59 = vpop.permute.xlu0 %1805 }
0x11ec   :  { %v1808_v14 = vmul.f32 %v2567_v58, %v1806_v59 }
0x1258   :  { %v1787_v8 = vpop.permute.xlu1 %1786 }
0x1259   :  { %v1789_v13 = vadd.f32 %v1787_v8, %v1779_v63 }
0x125b   :  { %2568 = vtanh.f32 %v1789_v13  ;;  %v1832_v37 = vrot.slane %v1789_v13, 4 }
0x125c   :  { %v1816_v20 = vpop.permute.xlu0 %1815 }
0x125d   :  { %v1818_v23 = vadd.f32 %v1816_v20, %v1808_v14 }
0x125f   :  { %2570 = vtanh.f32 %v1818_v23  ;;  %v1844_v1 = vrot.slane %v1818_v23, 2 }
0x1268   :  { %v2569_v25 = vpop.eup %2568 }
0x1269   :  { %1792 = vrot.lane.b32.xlu1 %v2569_v25, %s2768_s19 }
0x126c   :  { %v2571_v26 = vpop.eup %2570 }
0x126d   :  { %1821 = vrot.lane.b32.xlu0 %v2571_v26, %s2768_s19 }
0x12db   :  { %v1793_v28 = vpop.permute.xlu1 %1792 }
0x12dc   :  { %v1795_v32 = vmul.f32 %v2565_v3, %v1793_v28 }
0x12de   :  { %v1826_v33 = vrot.slane %v1795_v32, 4 }
0x12df   :  { %v1822_v36 = vpop.permute.xlu0 %1821 }
0x12e0   :  { %v1824_v5 = vmul.f32 %v2567_v58, %v1822_v36  ;;  %1827 = vrot.lane.b32.xlu1 %v1826_v33, %s2775_s0 }
0x12e2   :  { %v1838_v56 = vrot.slane %v1824_v5, 2 }
0x12e4   :  { %1839 = vrot.lane.b32.xlu0 %v1838_v56, %s2775_s0  ;;  %1833 = vrot.lane.b32.xlu1 %v1832_v37, %s2776_s11  ;;  %v1145_v56 = vsel %vm1110_vm3, %v3161_v38, 0.0 }
0x12e8   :  { %1845 = vrot.lane.b32.xlu0 %v1844_v1, %s2776_s11  ;;  %v1153_v1 = vrot.slane %v1145_v56, %v2946_v19 }
0x1352   :  { %v1828_v39 = vpop.permute.xlu1 %1827 }
0x1353   :  { %v3370_v42 = vsel %vm622_vm10, %v1828_v39, %v3305_v6  ;;  %v1849_v57 = vsel %vm622_vm10, %v1828_v39, 0.0  ;;  %v378_v39 = vrot.slane %v2937_v11, %v2946_v19  ;;  %v1154_v11 = vcombine.high %v1153_v1, %v1153_v1 }
0x1354   :  { %v1857_v41 = vrot.slane %v1849_v57, %v2946_v19  ;;  %v1905_v16 = vpack.c.bf16 %v3370_v42, %v3370_v42  ;;  %v1161_v57 = vrot.slane %v1153_v1, %v2946_v19 }
0x1355   :  { %v379_v31 = vcombine.high %v378_v39, %v378_v39 }
0x1356   :  { %v1858_v17 = vcombine.high %v1857_v41, %v1857_v41  ;;  %v1865_v27 = vrot.slane %v1857_v41, %v2946_v19  ;;  %v1840_v44 = vpop.permute.xlu0 %1839  ;;  %2418 = vmatmul.mubr.msk.bf16.vlgmr.msra.gmra.mxu1 %vm130_vm1, %v1905_v16  ;;  %v1834_v46 = vpop.permute.xlu1 %1833  ;;  %v1361_v16 = vsel %vm1110_vm3, %v3231_v48, 0.0  ;;  %v1172_v38 = vrot.slane %v1161_v57, %v2900_v15 }
0x1357   :  { %v3382_v45 = vsel %vm599_vm9, %v1840_v44, %v3317_v51  ;;  %v1877_v6 = vsel %vm599_vm9, %v1840_v44, 0.0  ;;  %v3402_v58 = vsel %vm622_vm10, %v1834_v46, %v3346_v7  ;;  %v1369_v44 = vrot.slane %v1361_v16, %v2946_v19 }
0x1358   :  { %v1872_v49 = vrot.slane %v1858_v17, %v2946_v19  ;;  %1875 = vst.msk [vmem:[#allocation10 + $0x6] sm:$0x1] %vm408_vm6, %v1865_v27  ;;  %v1885_v0 = vrot.slane %v1877_v6, %v2946_v19  ;;  %v1949_v50 = vpack.c.bf16 %v3382_v45, %v3382_v45  ;;  %v2006_v60 = vrot.slane %v3402_v58, 2 }
0x1359   :  { %v386_v27 = vrot.slane %v378_v39, %v2946_v19  ;;  %v1377_v6 = vrot.slane %v1369_v44, %v2946_v19  ;;  %v1168_v48 = vrot.slane %v1154_v11, %v2946_v19 }
0x135a   :  { %1876 = vst.msk [vmem:[#allocation10 + $0xe] sm:$0x1] %vm408_vm6, %v1872_v49  ;;  %v1886_v40 = vcombine.high %v1885_v0, %v1885_v0  ;;  %v1893_v43 = vrot.slane %v1885_v0, %v2946_v19  ;;  %2426 = vmatmul.mubr.msk.bf16.vlgmr.msra.gmra.mxu0 %vm130_vm1, %v1949_v50  ;;  %v1846_v61 = vpop.permute.xlu0 %1845  ;;  %vm2147_vm1 = vcmask 517376  }
0x135b   :  { %v397_v49 = vrot.slane %v386_v27, %v2900_v15  ;;  %v1388_v50 = vrot.slane %v1377_v6, %v2900_v15 }
0x135c   :  { %v1900_v51 = vrot.slane %v1886_v40, %v2946_v19  ;;  %1903 = vst.msk [vmem:[#allocation11 + $0x1] sm:$0x1] %vm408_vm6, %v1893_v43  ;;  %v1176_v40 = vrot.slane %v1168_v48, %v2900_v15  ;;  %v393_v43 = vrot.slane %v379_v31, %v2946_v19 }
0x135e   :  { %1904 = vst.msk [vmem:[#allocation11 + $0x9] sm:$0x1] %vm408_vm6, %v1900_v51 }
0x1416   :  { %v1943_v29 = vpop.f32.mrf.mxu1 }
0x1417   :  { %v1994_v22 = vrot.slane %v1943_v29, 2 }
0x1418   :  { %v2419_v52 = vpop.f32.mrf.mxu1 }
0x1419   :  { %v1996_v9 = vadd.f32 %v1994_v22, %v2905_v24 }
0x141a   :  { %v1946_v4 = vpop.f32.mrf.mxu1  ;;  %v1987_v53 = vpop.f32.mrf.mxu0 }
0x141b   :  { %2572 = vtanh.f32 %v1996_v9  ;;  %v1997_v54 = vadd.f32 %v1987_v53, %v2903_v21  ;;  %v1848_v21 = vsel %vm599_vm9, %v1846_v61, %v3353_v30  ;;  %v2251_v62 = vmul.f32 -1.442695, %v1996_v9 }
0x141c   :  { %v2420_v55 = vpop.f32.mrf.mxu1  ;;  %v2427_v12 = vpop.f32.mrf.mxu0 }
0x141d   :  { %2574 = vtanh.f32 %v1997_v54  ;;  %v2252_v34 = vmul.f32 -1.442695, %v1997_v54 }
0x141e   :  { %v1990_v47 = vpop.f32.mrf.mxu0  ;;  %2576 = vpow2.f32 %v2251_v62 }
0x141f   :  { %2578 = vpow2.f32 %v2252_v34  ;;  %v1370_v47 = vcombine.high %v1369_v44, %v1369_v44 }
0x1420   :  { %v2428_v3 = vpop.f32.mrf.mxu0 }
0x1421   :  { %v1384_v62 = vrot.slane %v1370_v47, %v2946_v19 }
0x1428   :  { %v2573_v10 = vpop.eup %2572 }
0x1429   :  { %2012 = vrot.lane.b32.xlu0 %v2573_v10, %s2768_s19 }
0x142a   :  { %v2575_v24 = vpop.eup %2574 }
0x142b   :  { %2040 = vrot.lane.b32.xlu1 %v2575_v24, %s2768_s19  ;;  %v2577_v7 = vpop.eup %2576 }
0x142c   :  { %v2579_v63 = vpop.eup %2578  ;;  %v2001_v59 = vadd.f32 1.0, %v2577_v7 }
0x142d   :  { %2007 = vrot.lane.b32.xlu0 %v2006_v60, %s2775_s0  ;;  %v2030_v8 = vadd.f32 1.0, %v2579_v63 }
0x142e   :  { %2580 = vrcp.f32 %v2001_v59 }
0x142f   :  { %2035 = vrot.lane.b32.xlu1 %v1848_v21, %s2775_s0  ;;  %2582 = vrcp.f32 %v2030_v8 }
0x143b   :  { %v2581_v13 = vpop.eup %2580 }
0x143c   :  { %v2583_v23 = vpop.eup %2582 }
0x149b   :  { %v2013_v14 = vpop.permute.xlu0 %2012 }
0x149c   :  { %v2015_v20 = vmul.f32 %v2581_v13, %v2013_v14 }
0x149d   :  { %v2041_v25 = vpop.permute.xlu1 %2040 }
0x149e   :  { %2017 = vrot.lane.b32.xlu0 %v2015_v20, %s2775_s0  ;;  %v2043_v35 = vmul.f32 %v2583_v23, %v2041_v25 }
0x149f   :  { %v2008_v30 = vpop.permute.xlu0 %2007 }
0x14a0   :  { %2045 = vrot.lane.b32.xlu1 %v2043_v35, %s2775_s0  ;;  %v2010_v26 = vmul.f32 %v2581_v13, %v2008_v30 }
0x14a1   :  { %v3414_v28 = vpop.permute.xlu1 %2035 }
0x14a2   :  { %v2038_v36 = vmul.f32 %v2583_v23, %v3414_v28 }
0x1510   :  { %v2018_v32 = vpop.permute.xlu0 %2017 }
0x1511   :  { %v2020_v33 = vadd.f32 %v2018_v32, %v2010_v26 }
0x1512   :  { %v2046_v5 = vpop.permute.xlu1 %2045 }
0x1513   :  { %2584 = vtanh.f32 %v2020_v33  ;;  %v2048_v37 = vadd.f32 %v2046_v5, %v2038_v36  ;;  %v2062_v0 = vrot.slane %v2020_v33, 6 }
0x1515   :  { %2586 = vtanh.f32 %v2048_v37  ;;  %v2072_v34 = vsel %vm351_vm4, %v2048_v37, %v3414_v28 }
0x1520   :  { %v2585_v41 = vpop.eup %2584 }
0x1521   :  { %2023 = vrot.lane.b32.xlu0 %v2585_v41, %s2768_s19 }
0x1522   :  { %v2587_v17 = vpop.eup %2586 }
0x1523   :  { %2051 = vrot.lane.b32.xlu1 %v2587_v17, %s2768_s19 }
0x1525   :  { %1177 = vrot.lane.b32.xlu0 %v1172_v38, %s2775_s0 }
0x1527   :  { %2068 = vrot.lane.b32.xlu1 %v3382_v45, %s2776_s11  ;;  %v401_v45 = vrot.slane %v393_v43, %v2900_v15 }
0x1529   :  { %402 = vrot.lane.b32.xlu0 %v397_v49, %s2775_s0 }
0x152b   :  { %2063 = vrot.lane.b32.xlu1 %v2062_v0, %s2776_s11 }
0x152d   :  { %1393 = vrot.lane.b32.xlu0 %v1388_v50, %s2775_s0 }
0x152f   :  { %1179 = vrot.lane.b32.xlu1 %v1176_v40, %s2775_s0 }
0x1533   :  { %404 = vrot.lane.b32.xlu1 %v401_v45, %s2775_s0 }
0x1593   :  { %v2024_v51 = vpop.permute.xlu0 %2023 }
0x1594   :  { %v2026_v29 = vmul.f32 %v2581_v13, %v2024_v51 }
0x1595   :  { %v2052_v52 = vpop.permute.xlu1 %2051 }
0x1596   :  { %v2056_v22 = vrot.slane %v2026_v29, 6  ;;  %v2054_v9 = vmul.f32 %v2583_v23, %v2052_v52 }
0x1597   :  { %v1178_v4 = vpop.permute.xlu0 %1177 }
0x1598   :  { %1183 = vst.msk [vmem:[#allocation11 + $0x4] sm:$0x1] %vm408_vm6, %v1178_v4  ;;  %2057 = vrot.lane.b32.xlu0 %v2056_v22, %s2775_s0  ;;  %v2101_v53 = vsel %vm351_vm4, %v2054_v9, 0.0 }
0x1599   :  { %v2109_v54 = vrot.slane %v2101_v53, %v2946_v19  ;;  %v2069_v55 = vpop.permute.xlu1 %2068 }
0x159b   :  { %v403_v12 = vpop.permute.xlu0 %402  ;;  %v2110_v3 = vcombine.high %v2109_v54, %v2109_v54  ;;  %v2117_v46 = vrot.slane %v2109_v54, %v2946_v19 }
0x159c   :  { %409 = vst.msk [vmem:[#allocation10] sm:$0x1] %vm408_vm6, %v403_v12 }
0x159d   :  { %v2124_v10 = vrot.slane %v2110_v3, %v2946_v19  ;;  %v2064_v24 = vpop.permute.xlu1 %2063  ;;  %v2128_v60 = vrot.slane %v2117_v46, %v2900_v15 }
0x159e   :  { %v2066_v61 = vsel %vm358_vm5, %v2064_v24, %v3402_v58 }
0x159f   :  { %v1394_v21 = vpop.permute.xlu0 %1393  ;;  %2149 = vst.msk [vmem:[#allocation14] sm:$0x3] %vm2141_vm0, %v2066_v61  ;;  %2133 = vrot.lane.b32.xlu0 %v2128_v60, %s2775_s0  ;;  %v2132_v7 = vrot.slane %v2124_v10, %v2900_v15 }
0x15a0   :  { %1399 = vst.msk [vmem:[#allocation10 + $0x4] sm:$0x1] %vm408_vm6, %v1394_v21 }
0x15a1   :  { %2150 = vst.msk [vmem:[#allocation14] sm:$0x3] %vm2147_vm1, %v2072_v34  ;;  %2135 = vrot.lane.b32.xlu1 %v2132_v7, %s2775_s0  ;;  %v1180_v58 = vpop.permute.xlu1 %1179 }
0x15a2   :  { %2683 = shalt.err (!%p2680_p10)
}
0x15a3   :  { %2194 = dma.vmem_to_hbm [thread:$0]  %s2192_s15, 32, %s3518_s9, [#allocation15]   ;;  %1184 = vst.msk [vmem:[#allocation11 + $0xc] sm:$0x1] %vm408_vm6, %v1180_v58  ;;  %v2071_v63 = vsel %vm351_vm4, %v2054_v9, %v2069_v55  ;;  %v1392_v59 = vrot.slane %v1384_v62, %v2900_v15 }
0x15a4   :  { %2144 = vrot.lane.b32.xlu0 %v2071_v63, %s2768_s19  ;;  %s2779_s9 = smov [#allocation11]   ;;  %s2780_s20 = smov [#allocation13]  }
0x15a5   :  { %1395 = vrot.lane.b32.xlu1 %v1392_v59, %s2775_s0  ;;  %v405_v8 = vpop.permute.xlu1 %404  ;;  %s2168_s19 = sshll.u32 %s2779_s9, 4  ;;  %s2181_s21 = sshll.u32 %s2780_s20, 4  ;;  %s2169_s19 = int_to_ptr.vmem [resolvable:$true] %s2168_s19  ;;  %s2182_s21 = int_to_ptr.vmem [resolvable:$true] %s2181_s21 }
0x15a6   :  { %410 = vst.msk [vmem:[#allocation10 + $0x8] sm:$0x1] %vm408_vm6, %v405_v8  ;;  %s2781_s22 = smov [#allocation10]   ;;  %s2692_s2 = scalar_lea.vmem %s2169_s19, 256 }
0x15a7   :  { %s2156_s23 = sshll.u32 %s2781_s22, 4  ;;  %p2693_p11 = scmp.ne.s32.totalorder %s2169_s19, %s2692_s2  ;;  %s2157_s23 = int_to_ptr.vmem [resolvable:$true] %s2156_s23 }
0x15a8   :  { %p2697_p12 = scmp.lt.s32.totalorder %s2169_s19, %s2169_s19  ;;  %p2698_p13 = scmp.lt.s32.totalorder %s2692_s2, %s2692_s2 }
0x15aa   :  { %p2699_p0 = por %p2698_p13, %p2697_p12 }
0x15ac   :  { %p2700_p1 = pnand %p2699_p0, %p2693_p11 }
0x160a   :  { %v2058_v13 = vpop.permute.xlu0 %2057 }
0x160b   :  { %v2060_v14 = vsel %vm358_vm5, %v2058_v13, %v3370_v42  ;;  %v2073_v20 = vsel %vm358_vm5, %v2058_v13, 0.0 }
0x160c   :  { %v2081_v2 = vrot.slane %v2073_v20, %v2946_v19  ;;  %2142 = vst.msk [vmem:[#allocation13] sm:$0x3] %vm2141_vm0, %v2060_v14 }
0x160e   :  { %v2082_v23 = vcombine.high %v2081_v2, %v2081_v2  ;;  %v2089_v15 = vrot.slane %v2081_v2, %v2946_v19 }
0x1610   :  { %v2096_v25 = vrot.slane %v2082_v23, %v2946_v19  ;;  %2099 = vst.msk [vmem:[#allocation10 + $0x7] sm:$0x1] %vm408_vm6, %v2089_v15 }
0x1611   :  { %v2134_v35 = vpop.permute.xlu0 %2133 }
0x1612   :  { %2100 = vst.msk [vmem:[#allocation10 + $0xf] sm:$0x1] %vm408_vm6, %v2096_v25  ;;  %2139 = vst.msk [vmem:[#allocation11] sm:$0x1] %vm408_vm6, %v2134_v35 }
0x1613   :  { %v2136_v18 = vpop.permute.xlu1 %2135 }
0x1614   :  { %2140 = vst.msk [vmem:[#allocation11 + $0x8] sm:$0x1] %vm408_vm6, %v2136_v18 }
0x1616   :  { %v2145_v42 = vpop.permute.xlu0 %2144 }
0x1617   :  { %2703 = shalt.err (!%p2700_p1)
}
0x1618   :  { %2174 = dma.vmem_to_hbm [thread:$0]  %s2169_s19, 256, %s3516_s7, [#allocation12], %s2765_s12, %s2765_s12, %s2766_s13   ;;  %2148 = vst.msk [vmem:[#allocation13] sm:$0x3] %vm2147_vm1, %v2145_v42  ;;  %v1396_v19 = vpop.permute.xlu1 %1395 }
0x1619   :  { %s2712_s26 = scalar_lea.vmem %s2182_s21, 32  ;;  %p2717_p3 = scmp.lt.s32.totalorder %s2182_s21, %s2182_s21 }
0x161a   :  { %p2713_p2 = scmp.ne.s32.totalorder %s2182_s21, %s2712_s26  ;;  %p2718_p4 = scmp.lt.s32.totalorder %s2712_s26, %s2712_s26 }
0x161c   :  { %p2719_p5 = por %p2718_p4, %p2717_p3 }
0x161e   :  { %p2720_p6 = pnand %p2719_p5, %p2713_p2 }
0x1620   :  { %2723 = shalt.err (!%p2720_p6)
}
0x1621   :  { %2184 = dma.vmem_to_hbm [thread:$0]  %s2182_s21, 32, %s3517_s8, [#allocation12]   ;;  %1400 = vst.msk [vmem:[#allocation10 + $0xc] sm:$0x1] %vm408_vm6, %v1396_v19 }
0x1622   :  { %s2732_s1 = scalar_lea.vmem %s2157_s23, 256  ;;  %p2737_p8 = scmp.lt.s32.totalorder %s2157_s23, %s2157_s23 }
0x1623   :  { %p2733_p7 = scmp.ne.s32.totalorder %s2157_s23, %s2732_s1  ;;  %p2738_p9 = scmp.lt.s32.totalorder %s2732_s1, %s2732_s1 }
0x1625   :  { %p2739_p10 = por %p2738_p9, %p2737_p8 }
0x1627   :  { %p2740_p11 = pnand %p2739_p10, %p2733_p7 }
0x1629   :  { %2743 = shalt.err (!%p2740_p11)
}
0x162a   :  { %2162 = dma.vmem_to_hbm [thread:$0]  %s2157_s23, 256, %s3515_s6, [#allocation4], %s2765_s12, %s2765_s12, %s2766_s13  }
0x162b   :  { %2758 = dma.done.wait [#allocation4], 256  }
0x162c   :  { %2759 = vsyncadd [#allocation4], 4294967040 }
0x162d   :  { %2760 = dma.done.wait [#allocation12], 288  }
0x162e   :  { %2761 = vsyncadd [#allocation12], 4294967008 }
0x162f   :  { %2762 = dma.done.wait [#allocation15], 32  }
0x1630   :  { %2763 = vsyncadd [#allocation15], 4294967264 }
0x1631   :  { %2207 = vsyncpa [#allocation3], 1 }
0x1632   :  { %2208 = vsyncpa [#allocation6], 1 }
0x1633   :  { %2209 = vsyncpa [#allocation9], 1 }
0x1634   :  { %2210 = vsyncpa [#allocation4], 1 }
0x1635   :  { %2211 = vsyncpa [#allocation12], 1 }
0x1636   :  { %2212 = vsyncpa [#allocation15], 1 }

</bundles_post_ra>
